<compile_context>
chip_gen: v5e
topology: v5e:2x2
jax: 0.10.0
libtpu: 0.0.40
codegen_flags: <defaults>
</compile_context>

<pallas_src>
import contextlib
import functools
import os
import sys

import jax
import jax.numpy as jnp
from jax import lax
from jax.experimental import pallas as pl
from jax.experimental.pallas import tpu as pltpu


# ----------------------------------------------------------------------------
# Pure-JAX reference (exact reproduction of the PyTorch forward).
# ----------------------------------------------------------------------------
def _reference(src, flow):
    B, C, H, W = src.shape
    gy, gx = jnp.meshgrid(jnp.arange(H, dtype=jnp.float32),
                          jnp.arange(W, dtype=jnp.float32), indexing="ij")
    ny = 2.0 * ((gy[None] + flow[:, 0]) / (H - 1.0) - 0.5)
    nx = 2.0 * ((gx[None] + flow[:, 1]) / (W - 1.0) - 0.5)
    iy = jnp.clip(((ny + 1.0) * H - 1.0) * 0.5, 0.0, H - 1.0)
    ix = jnp.clip(((nx + 1.0) * W - 1.0) * 0.5, 0.0, W - 1.0)
    iy0f, ix0f = jnp.floor(iy), jnp.floor(ix)
    ty, tx = iy - iy0f, ix - ix0f
    iy0, ix0 = iy0f.astype(jnp.int32), ix0f.astype(jnp.int32)
    iy1, ix1 = jnp.minimum(iy0 + 1, H - 1), jnp.minimum(ix0 + 1, W - 1)
    src_flat = src.reshape(B, C, H * W)

    def gather(iy_, ix_):
        idx = (iy_ * W + ix_).reshape(B, 1, H * W)
        idx = jnp.broadcast_to(idx, (B, C, H * W))
        return jnp.take_along_axis(src_flat, idx, axis=2).reshape(B, C, H, W)

    w00 = ((1 - ty) * (1 - tx))[:, None]
    w01 = ((1 - ty) * tx)[:, None]
    w10 = (ty * (1 - tx))[:, None]
    w11 = (ty * tx)[:, None]
    return (w00 * gather(iy0, ix0) + w01 * gather(iy0, ix1)
            + w10 * gather(iy1, ix0) + w11 * gather(iy1, ix1))


# ----------------------------------------------------------------------------
# Shared in-kernel coordinate math (one tile of `tn` output pixels).
# coords: (2, tn) precomputed (gy, gx) -> no per-tile integer div/mod.
# ----------------------------------------------------------------------------
def _sample_coords(coords, flow2, H, W):
    """Returns ((idx00, idx01, idx10, idx11), (w00, w01, w10, w11)); (1, tn)."""
    f32 = jnp.float32
    gy = coords[0:1, :]
    gx = coords[1:2, :]
    fy = flow2[0:1, :].astype(f32)          # row displacement
    fx = flow2[1:2, :].astype(f32)          # col displacement
    # Fold the module's normalization 2*((g+f)/(S-1)-0.5) and grid_sample's
    # align_corners=False unnormalization ((n+1)*S-1)/2 into one affine map:
    #   i = (g + f) * S/(S-1) - 0.5.  (S == 1 is degenerate; clamp handles it.)
    sy = float(H) / float(H - 1) if H > 1 else 0.0
    sx = float(W) / float(W - 1) if W > 1 else 0.0
    iy = jnp.clip((gy + fy) * sy - 0.5, 0.0, float(H - 1))   # border padding
    ix = jnp.clip((gx + fx) * sx - 0.5, 0.0, float(W - 1))
    iy0f, ix0f = jnp.floor(iy), jnp.floor(ix)
    ty, tx = iy - iy0f, ix - ix0f
    iy0 = iy0f.astype(jnp.int32)
    ix0 = ix0f.astype(jnp.int32)
    iy1 = jnp.minimum(iy0 + 1, H - 1)
    ix1 = jnp.minimum(ix0 + 1, W - 1)
    w00 = (1.0 - ty) * (1.0 - tx)
    w01 = (1.0 - ty) * tx
    w10 = ty * (1.0 - tx)
    w11 = ty * tx
    flat = lambda a, b: a * W + b
    return ((flat(iy0, ix0), flat(iy0, ix1), flat(iy1, ix0), flat(iy1, ix1)),
            (w00, w01, w10, w11))


# ----------------------------------------------------------------------------
# Primary kernel: direct 4-neighbour gather (O(C*P)).
# ----------------------------------------------------------------------------
def _st_gather_kernel(src_ref, coord_ref, flow_ref, out_ref, *, H, W, tn):
    # src_ref: (1, Cb, P_pad) native dtype; coord_ref: (2, tn) f32;
    # flow_ref: (1, 2, tn) f32; out_ref: (1, Cb, tn).
    idxs, wts = _sample_coords(coord_ref[...], flow_ref[0], H, W)
    src = src_ref[0]                      # gather in native dtype; cast the
    cb = src.shape[0]                     # small (Cb, tn) result only.

    def gather(idx):                      # (1, tn) -> (Cb, tn) f32
        idxb = jnp.broadcast_to(idx, (cb, tn))
        g = jnp.take_along_axis(src, idxb, axis=1, mode="promise_in_bounds")
        return g.astype(jnp.float32)

    out = wts[0] * gather(idxs[0])
    out += wts[1] * gather(idxs[1])
    out += wts[2] * gather(idxs[2])
    out += wts[3] * gather(idxs[3])
    out_ref[0] = out.astype(out_ref.dtype)


# ----------------------------------------------------------------------------
# Fallback kernel: weighted one-hot "sampling matrix" + MXU matmul, tiled over
# output pixels (tn) AND source pixels (tk) with an f32 accumulator, so VMEM
# is bounded by tk*tn regardless of the image size.  The coordinate math is
# hoisted out of the k reduction into small VMEM scratch.
# ----------------------------------------------------------------------------
def _st_onehot_matmul_kernel(src_ref, coord_ref, flow_ref, out_ref,
                             acc_ref, idx_ref, wt_ref, *, H, W, tn, tk):
    k = pl.program_id(2)

    @pl.when(k == 0)
    def _():
        acc_ref[...] = jnp.zeros_like(acc_ref)
        # Flow tile is resident across k: compute indices/weights once.
        (i00, i01, i10, i11), (w00, w01, w10, w11) = _sample_coords(
            coord_ref[...], flow_ref[0], H, W)
        idx_ref[0:1, :] = i00
        idx_ref[1:2, :] = i01
        idx_ref[2:3, :] = i10
        idx_ref[3:4, :] = i11
        wt_ref[0:1, :] = w00
        wt_ref[1:2, :] = w01
        wt_ref[2:3, :] = w10
        wt_ref[3:4, :] = w11

    # Weighted one-hot mask for this (tk x tn) tile.  Additive scatter is
    # required: at clamped borders neighbours may coincide and their weights
    # must add (matches grid_sample's border padding).
    q = k * tk + lax.broadcasted_iota(jnp.int32, (tk, tn), 0)
    s_t = jnp.where(q == idx_ref[0:1, :], wt_ref[0:1, :], 0.0)
    s_t += jnp.where(q == idx_ref[1:2, :], wt_ref[1:2, :], 0.0)
    s_t += jnp.where(q == idx_ref[2:3, :], wt_ref[2:3, :], 0.0)
    s_t += jnp.where(q == idx_ref[3:4, :], wt_ref[3:4, :], 0.0)

    acc_ref[...] += jnp.dot(src_ref[0], s_t, preferred_element_type=jnp.float32)

    @pl.when(k == pl.num_programs(2) - 1)
    def _():
        out_ref[0] = acc_ref[...].astype(out_ref.dtype)


# ----------------------------------------------------------------------------
# pallas_call builders.
# ----------------------------------------------------------------------------
def _round_up(x, m):
    return (x + m - 1) // m * m


def _vmem_limit_bytes():
    # Generation-aware scoped-VMEM budget: ~80% of physical VMEM
    # (v5e/v6e: 128 MiB -> ~102 MiB, v7x: 64 MiB -> ~51 MiB).
    try:
        cap = int(pltpu.get_tpu_info().vmem_capacity_bytes)
    except Exception:
        cap = 64 << 20
    return max(32 << 20, int(cap * 0.8))


def _pick_tile(p_pad, cap):
    for cand in range(min(cap, p_pad), 0, -128):
        if p_pad % cand == 0:
            return cand
    return 128


def _pick_cb(C, p_pad, itemsize, budget):
    """Channel block for the gather path so the resident src block fits VMEM
    (worst case: double-buffered).  Channel blocks must be a multiple of 8."""
    need = lambda cb: 2 * cb * p_pad * itemsize
    if need(C) <= budget or C < 16:
        return C
    cb = (C // 8) * 8
    while cb >= 8:
        if C % cb == 0 and need(cb) <= budget:
            return cb
        cb -= 8
    return C


def _make_gather_call(B, C, H, W, p_pad, tn, cb, dtype, single_buffer_src):
    nt = p_pad // tn
    nc = C // cb
    kernel = functools.partial(_st_gather_kernel, H=H, W=W, tn=tn)
    vmem_limit = _vmem_limit_bytes()

    def call(src_flat, coords, flow_flat):
        src_spec_kwargs = {}
        if single_buffer_src:
            # The src block index never changes along the pixel axis; a single
            # buffer halves its resident footprint (matters on v7x's 64 MiB).
            src_spec_kwargs["pipeline_mode"] = pl.Buffered(1)
        return pl.pallas_call(
            kernel,
            out_shape=jax.ShapeDtypeStruct((B, C, p_pad), dtype),
            grid_spec=pltpu.PrefetchScalarGridSpec(
                num_scalar_prefetch=0,
                grid=(B, nc, nt),
                in_specs=[
                    pl.BlockSpec((1, cb, p_pad), lambda b, c, n: (b, c, 0),
                                 **src_spec_kwargs),
                    pl.BlockSpec((2, tn), lambda b, c, n: (0, n)),
                    pl.BlockSpec((1, 2, tn), lambda b, c, n: (b, 0, n)),
                ],
                out_specs=pl.BlockSpec((1, cb, tn), lambda b, c, n: (b, c, n)),
            ),
            compiler_params=pltpu.CompilerParams(
                dimension_semantics=("parallel", "parallel", "parallel"),
                vmem_limit_bytes=vmem_limit),
        )(src_flat, coords, flow_flat)

    return call


def _make_onehot_call(B, C, H, W, p_pad, tn, tk, dtype):
    nt, nk = p_pad // tn, p_pad // tk
    kernel = functools.partial(_st_onehot_matmul_kernel, H=H, W=W, tn=tn, tk=tk)
    vmem_limit = _vmem_limit_bytes()

    def call(src_flat, coords, flow_flat):
        return pl.pallas_call(
            kernel,
            out_shape=jax.ShapeDtypeStruct((B, C, p_pad), dtype),
            grid_spec=pltpu.PrefetchScalarGridSpec(
                num_scalar_prefetch=0,
                grid=(B, nt, nk),
                in_specs=[
                    pl.BlockSpec((1, C, tk), lambda b, n, k: (b, 0, k)),
                    pl.BlockSpec((2, tn), lambda b, n, k: (0, n)),
                    pl.BlockSpec((1, 2, tn), lambda b, n, k: (b, 0, n)),
                ],
                out_specs=pl.BlockSpec((1, C, tn), lambda b, n, k: (b, 0, n)),
                scratch_shapes=[
                    pltpu.VMEM((C, tn), jnp.float32),   # accumulator
                    pltpu.VMEM((4, tn), jnp.int32),     # hoisted flat indices
                    pltpu.VMEM((4, tn), jnp.float32),   # hoisted weights
                ],
            ),
            compiler_params=pltpu.CompilerParams(
                dimension_semantics=("parallel", "parallel", "arbitrary"),
                vmem_limit_bytes=vmem_limit),
        )(src_flat, coords, flow_flat)

    return call


# ----------------------------------------------------------------------------
# Implementation selection (gather if Mosaic can lower it, else dense fallback).
# ----------------------------------------------------------------------------
@contextlib.contextmanager
def _silence_stderr():
    """Suppress MLIR/Mosaic diagnostics while probing the gather path."""
    try:
        fd = sys.stderr.fileno()
    except Exception:
        yield
        return
    saved = os.dup(fd)
    try:
        with open(os.devnull, "w") as devnull:
            os.dup2(devnull.fileno(), fd)
            yield
    finally:
        os.dup2(saved, fd)
        os.close(saved)


def _pad_flat(x, p_pad):
    p = x.shape[-1]
    return x if p == p_pad else jnp.pad(x, ((0, 0), (0, 0), (0, p_pad - p)))


@functools.lru_cache(maxsize=None)
def _make_coords(W, p_pad):
    p = jnp.arange(p_pad, dtype=jnp.int32)
    return jnp.stack([(p // W).astype(jnp.float32),
                      (p % W).astype(jnp.float32)], axis=0)   # (2, p_pad)


def _probe_ok(call, B, C, H, W, P, p_pad, coords, dtype):
    """Compile + run `call` on deterministic data and verify against the
    pure-JAX reference.  Any failure (lowering, compile, runtime, numerics)
    routes us to the next candidate / dense fallback kernel."""
    tol = 5e-4 if jnp.dtype(dtype).itemsize >= 4 else 5e-2
    try:
        with _silence_stderr():
            ks, kf = jax.random.split(jax.random.PRNGKey(7))
            src = jax.random.normal(ks, (B, C, H, W), dtype=jnp.float32).astype(dtype)
            flow = 2.0 * jax.random.normal(kf, (B, 2, H, W), dtype=jnp.float32)
            out = call(_pad_flat(src.reshape(B, C, P), p_pad),
                       coords,
                       _pad_flat(flow.reshape(B, 2, P), p_pad))
            out = jax.block_until_ready(out)[:, :, :P].reshape(B, C, H, W)
            ref = _reference(src.astype(jnp.float32), flow)
            err = jnp.max(jnp.abs(out.astype(jnp.float32) - ref))
            return bool(err < tol)
    except Exception:
        return False


@functools.lru_cache(maxsize=None)
def _get_impl(B, C, H, W, dtype_name):
    dtype = jnp.dtype(dtype_name)
    P = H * W
    p_pad = _round_up(P, 128)
    coords = _make_coords(W, p_pad)

    vmem_budget = _vmem_limit_bytes()
    tn_g = _pick_tile(p_pad, 2048)             # wide, lane-dense output tiles
    cb = _pick_cb(C, p_pad, dtype.itemsize, int(0.6 * vmem_budget))

    candidates = [
        _make_gather_call(B, C, H, W, p_pad, tn_g, cb, dtype, True),   # 1-buf src
        _make_gather_call(B, C, H, W, p_pad, tn_g, cb, dtype, False),  # default
    ]
    for make in candidates:
        call = jax.jit(make)
        if _probe_ok(call, B, C, H, W, P, p_pad, coords, dtype):
            return call, p_pad

    # Mosaic could not lower the vector gather for this shape/generation:
    # use the VMEM-bounded tiled one-hot-matmul fallback instead.
    t_f = _pick_tile(p_pad, 512)
    onehot_call = jax.jit(_make_onehot_call(B, C, H, W, p_pad, t_f, t_f, dtype))
    return onehot_call, p_pad


def spatial_transformer(src, flow):
    """Forward of SpatialTransformer(size=(H, W), mode='bilinear').

    src:  (B, C, H, W) moving image.
    flow: (B, 2, H, W); channel 0 displaces rows (H), channel 1 columns (W).
    Returns (B, C, H, W), matching F.grid_sample(..., mode='bilinear',
    padding_mode='border', align_corners=False).
    """
    B, C, H, W = src.shape
    assert flow.shape == (B, 2, H, W), flow.shape
    P = H * W
    impl, p_pad = _get_impl(B, C, H, W, jnp.dtype(src.dtype).name)
    coords = _make_coords(W, p_pad)
    src_flat = _pad_flat(src.reshape(B, C, P), p_pad)
    flow_flat = _pad_flat(flow.astype(jnp.float32).reshape(B, 2, P), p_pad)
    out_flat = impl(src_flat, coords, flow_flat)
    return out_flat[:, :, :P].reshape(B, C, H, W)


# ----------------------------------------------------------------------------
# Self-test.
# ----------------------------------------------------------------------------
if __name__ == "__main__":
    key = jax.random.PRNGKey(0)
    k_src, k_flow = jax.random.split(key)

    B, C, H, W = 2, 4, 16, 16
    src = jax.random.normal(k_src, (B, C, H, W), dtype=jnp.float32)
    flow = 3.0 * jax.random.normal(k_flow, (B, 2, H, W), dtype=jnp.float32)

    out = jax.block_until_ready(spatial_transformer(src, flow))
    assert out.shape == (B, C, H, W)
    err = float(jnp.max(jnp.abs(out - _reference(src, flow))))
    assert err < 1e-4, f"mismatch vs reference, max abs err = {err}"

    # Non-128-aligned spatial size exercises the padded-pixel path.
    B2, C2, H2, W2 = 1, 4, 20, 12
    src2 = jax.random.normal(k_src, (B2, C2, H2, W2), dtype=jnp.float32)
    flow2 = 2.5 * jax.random.normal(k_flow, (B2, 2, H2, W2), dtype=jnp.float32)
    out2 = jax.block_until_ready(spatial_transformer(src2, flow2))
    err2 = float(jnp.max(jnp.abs(out2 - _reference(src2, flow2))))
    assert err2 < 1e-4, f"mismatch vs reference (padded case), max abs err = {err2}"

    print("KERNEL_OK")
</pallas_src>

<mosaic_0001>
module attributes {stable_mosaic.version = 11 : i64} {
  func.func @_st_gather_kernel(%arg0: i32, %arg1: i32, %arg2: i32, %arg3: memref<1x4x256xf32, #tpu.memory_space<vmem>>, %arg4: memref<2x256xf32, #tpu.memory_space<vmem>>, %arg5: memref<1x2x256xf32, #tpu.memory_space<vmem>>, %arg6: memref<1x4x256xf32, #tpu.memory_space<vmem>>) attributes {dimension_semantics = [#tpu.dimension_semantics<parallel>, #tpu.dimension_semantics<parallel>, #tpu.dimension_semantics<parallel>], iteration_bounds = array<i64: 2, 1, 1>, scalar_prefetch = 0 : i64, scratch_operands = 0 : i64, tpu.core_type = #tpu.core_type<tc>, window_params = [{pipeline_mode = #tpu.pipeline_mode<synchronous>, transform_indices = @transform_0, window_bounds = array<i64: 1, 4, 256>}, {transform_indices = @transform_1, window_bounds = array<i64: 2, 256>}, {transform_indices = @transform_2, window_bounds = array<i64: 1, 2, 256>}, {transform_indices = @transform_3, window_bounds = array<i64: 1, 4, 256>}]} {
    %c0 = arith.constant 0 : index
    %c0_0 = arith.constant 0 : index
    %0 = vector.load %arg4[%c0, %c0_0] : memref<2x256xf32, #tpu.memory_space<vmem>>, vector<2x256xf32>
    %c0_1 = arith.constant 0 : index
    %c0_2 = arith.constant 0 : index
    %c0_3 = arith.constant 0 : index
    %1 = vector.load %arg5[%c0_1, %c0_2, %c0_3] : memref<1x2x256xf32, #tpu.memory_space<vmem>>, vector<1x2x256xf32>
    %2 = vector.shape_cast %1 : vector<1x2x256xf32> to vector<2x256xf32>
    %3 = vector.extract_strided_slice %0 {offsets = [0, 0], sizes = [1, 256], strides = [1, 1]} : vector<2x256xf32> to vector<1x256xf32>
    %4 = vector.extract_strided_slice %0 {offsets = [1, 0], sizes = [1, 256], strides = [1, 1]} : vector<2x256xf32> to vector<1x256xf32>
    %5 = vector.extract_strided_slice %2 {offsets = [0, 0], sizes = [1, 256], strides = [1, 1]} : vector<2x256xf32> to vector<1x256xf32>
    %6 = vector.extract_strided_slice %2 {offsets = [1, 0], sizes = [1, 256], strides = [1, 1]} : vector<2x256xf32> to vector<1x256xf32>
    %7 = arith.addf %3, %5 : vector<1x256xf32>
    %cst = arith.constant 1.06666672 : f32
    %8 = vector.broadcast %cst : f32 to vector<1x256xf32>
    %9 = arith.mulf %7, %8 : vector<1x256xf32>
    %cst_4 = arith.constant 5.000000e-01 : f32
    %10 = vector.broadcast %cst_4 : f32 to vector<1x256xf32>
    %11 = arith.subf %9, %10 : vector<1x256xf32>
    %cst_5 = arith.constant 0.000000e+00 : f32
    %cst_6 = arith.constant 1.500000e+01 : f32
    %12 = vector.broadcast %cst_5 : f32 to vector<1x256xf32>
    %13 = arith.maximumf %12, %11 : vector<1x256xf32>
    %14 = vector.broadcast %cst_6 : f32 to vector<1x256xf32>
    %15 = arith.minimumf %14, %13 : vector<1x256xf32>
    %16 = arith.addf %4, %6 : vector<1x256xf32>
    %cst_7 = arith.constant 1.06666672 : f32
    %17 = vector.broadcast %cst_7 : f32 to vector<1x256xf32>
    %18 = arith.mulf %16, %17 : vector<1x256xf32>
    %cst_8 = arith.constant 5.000000e-01 : f32
    %19 = vector.broadcast %cst_8 : f32 to vector<1x256xf32>
    %20 = arith.subf %18, %19 : vector<1x256xf32>
    %cst_9 = arith.constant 0.000000e+00 : f32
    %cst_10 = arith.constant 1.500000e+01 : f32
    %21 = vector.broadcast %cst_9 : f32 to vector<1x256xf32>
    %22 = arith.maximumf %21, %20 : vector<1x256xf32>
    %23 = vector.broadcast %cst_10 : f32 to vector<1x256xf32>
    %24 = arith.minimumf %23, %22 : vector<1x256xf32>
    %25 = math.floor %15 : vector<1x256xf32>
    %26 = math.floor %24 : vector<1x256xf32>
    %27 = arith.subf %15, %25 : vector<1x256xf32>
    %28 = arith.subf %24, %26 : vector<1x256xf32>
    %29 = arith.fptosi %25 : vector<1x256xf32> to vector<1x256xi32>
    %30 = arith.fptosi %26 : vector<1x256xf32> to vector<1x256xi32>
    %c1_i32 = arith.constant 1 : i32
    %31 = vector.broadcast %c1_i32 : i32 to vector<1x256xi32>
    %32 = arith.addi %29, %31 : vector<1x256xi32>
    %c15_i32 = arith.constant 15 : i32
    %33 = vector.broadcast %c15_i32 : i32 to vector<1x256xi32>
    %34 = arith.minsi %32, %33 : vector<1x256xi32>
    %c1_i32_11 = arith.constant 1 : i32
    %35 = vector.broadcast %c1_i32_11 : i32 to vector<1x256xi32>
    %36 = arith.addi %30, %35 : vector<1x256xi32>
    %c15_i32_12 = arith.constant 15 : i32
    %37 = vector.broadcast %c15_i32_12 : i32 to vector<1x256xi32>
    %38 = arith.minsi %36, %37 : vector<1x256xi32>
    %cst_13 = arith.constant 1.000000e+00 : f32
    %39 = vector.broadcast %cst_13 : f32 to vector<1x256xf32>
    %40 = arith.subf %39, %27 : vector<1x256xf32>
    %cst_14 = arith.constant 1.000000e+00 : f32
    %41 = vector.broadcast %cst_14 : f32 to vector<1x256xf32>
    %42 = arith.subf %41, %28 : vector<1x256xf32>
    %43 = arith.mulf %40, %42 : vector<1x256xf32>
    %cst_15 = arith.constant 1.000000e+00 : f32
    %44 = vector.broadcast %cst_15 : f32 to vector<1x256xf32>
    %45 = arith.subf %44, %27 : vector<1x256xf32>
    %46 = arith.mulf %45, %28 : vector<1x256xf32>
    %cst_16 = arith.constant 1.000000e+00 : f32
    %47 = vector.broadcast %cst_16 : f32 to vector<1x256xf32>
    %48 = arith.subf %47, %28 : vector<1x256xf32>
    %49 = arith.mulf %27, %48 : vector<1x256xf32>
    %50 = arith.mulf %27, %28 : vector<1x256xf32>
    %c16_i32 = arith.constant 16 : i32
    %51 = vector.broadcast %c16_i32 : i32 to vector<1x256xi32>
    %52 = arith.muli %29, %51 : vector<1x256xi32>
    %53 = arith.addi %52, %30 : vector<1x256xi32>
    %c16_i32_17 = arith.constant 16 : i32
    %54 = vector.broadcast %c16_i32_17 : i32 to vector<1x256xi32>
    %55 = arith.muli %29, %54 : vector<1x256xi32>
    %56 = arith.addi %55, %38 : vector<1x256xi32>
    %c16_i32_18 = arith.constant 16 : i32
    %57 = vector.broadcast %c16_i32_18 : i32 to vector<1x256xi32>
    %58 = arith.muli %34, %57 : vector<1x256xi32>
    %59 = arith.addi %58, %30 : vector<1x256xi32>
    %c16_i32_19 = arith.constant 16 : i32
    %60 = vector.broadcast %c16_i32_19 : i32 to vector<1x256xi32>
    %61 = arith.muli %34, %60 : vector<1x256xi32>
    %62 = arith.addi %61, %38 : vector<1x256xi32>
    %c0_20 = arith.constant 0 : index
    %c0_21 = arith.constant 0 : index
    %c0_22 = arith.constant 0 : index
    %63 = vector.load %arg3[%c0_20, %c0_21, %c0_22] : memref<1x4x256xf32, #tpu.memory_space<vmem>>, vector<1x4x256xf32>
    %64 = vector.shape_cast %63 : vector<1x4x256xf32> to vector<4x256xf32>
    %65 = vector.shape_cast %53 : vector<1x256xi32> to vector<1x256xi32>
    %66 = vector.broadcast %65 : vector<1x256xi32> to vector<4x256xi32>
    %67 = vector.shape_cast %66 : vector<4x256xi32> to vector<4x256x1xi32>
    %68 = vector.shape_cast %67 : vector<4x256x1xi32> to vector<4x256xi32>
    %69 = tpu.dynamic_gather %64[%68] in [1] : vector<4x256xf32>, vector<4x256xi32> -> vector<4x256xf32>
    %70 = vector.broadcast %43 : vector<1x256xf32> to vector<4x256xf32>
    %71 = arith.mulf %70, %69 : vector<4x256xf32>
    %72 = vector.shape_cast %56 : vector<1x256xi32> to vector<1x256xi32>
    %73 = vector.broadcast %72 : vector<1x256xi32> to vector<4x256xi32>
    %74 = vector.shape_cast %73 : vector<4x256xi32> to vector<4x256x1xi32>
    %75 = vector.shape_cast %74 : vector<4x256x1xi32> to vector<4x256xi32>
    %76 = tpu.dynamic_gather %64[%75] in [1] : vector<4x256xf32>, vector<4x256xi32> -> vector<4x256xf32>
    %77 = vector.broadcast %46 : vector<1x256xf32> to vector<4x256xf32>
    %78 = arith.mulf %77, %76 : vector<4x256xf32>
    %79 = arith.addf %71, %78 : vector<4x256xf32>
    %80 = vector.shape_cast %59 : vector<1x256xi32> to vector<1x256xi32>
    %81 = vector.broadcast %80 : vector<1x256xi32> to vector<4x256xi32>
    %82 = vector.shape_cast %81 : vector<4x256xi32> to vector<4x256x1xi32>
    %83 = vector.shape_cast %82 : vector<4x256x1xi32> to vector<4x256xi32>
    %84 = tpu.dynamic_gather %64[%83] in [1] : vector<4x256xf32>, vector<4x256xi32> -> vector<4x256xf32>
    %85 = vector.broadcast %49 : vector<1x256xf32> to vector<4x256xf32>
    %86 = arith.mulf %85, %84 : vector<4x256xf32>
    %87 = arith.addf %79, %86 : vector<4x256xf32>
    %88 = vector.shape_cast %62 : vector<1x256xi32> to vector<1x256xi32>
    %89 = vector.broadcast %88 : vector<1x256xi32> to vector<4x256xi32>
    %90 = vector.shape_cast %89 : vector<4x256xi32> to vector<4x256x1xi32>
    %91 = vector.shape_cast %90 : vector<4x256x1xi32> to vector<4x256xi32>
    %92 = tpu.dynamic_gather %64[%91] in [1] : vector<4x256xf32>, vector<4x256xi32> -> vector<4x256xf32>
    %93 = vector.broadcast %50 : vector<1x256xf32> to vector<4x256xf32>
    %94 = arith.mulf %93, %92 : vector<4x256xf32>
    %95 = arith.addf %87, %94 : vector<4x256xf32>
    %c0_23 = arith.constant 0 : index
    %c0_24 = arith.constant 0 : index
    %c0_25 = arith.constant 0 : index
    %96 = vector.load %arg6[%c0_23, %c0_24, %c0_25] : memref<1x4x256xf32, #tpu.memory_space<vmem>>, vector<1x4x256xf32>
    %97 = vector.shape_cast %96 : vector<1x4x256xf32> to vector<4x256xf32>
    %98 = vector.shape_cast %95 : vector<4x256xf32> to vector<1x4x256xf32>
    tpu.vector_store %arg6[%c0_23, %c0_24, %c0_25], %98 {strides = array<i32>} : memref<1x4x256xf32, #tpu.memory_space<vmem>>, vector<1x4x256xf32>,
    return
  }
  func.func @transform_0(%arg0: i32, %arg1: i32, %arg2: i32) -> (i32, i32, i32) {
    %c0_i32 = arith.constant 0 : i32
    %c0_i32_0 = arith.constant 0 : i32
    return %arg0, %arg1, %c0_i32 : i32, i32, i32
  }
  func.func @transform_1(%arg0: i32, %arg1: i32, %arg2: i32) -> (i32, i32) {
    %c0_i32 = arith.constant 0 : i32
    %c0_i32_0 = arith.constant 0 : i32
    return %c0_i32, %arg2 : i32, i32
  }
  func.func @transform_2(%arg0: i32, %arg1: i32, %arg2: i32) -> (i32, i32, i32) {
    %c0_i32 = arith.constant 0 : i32
    %c0_i32_0 = arith.constant 0 : i32
    return %arg0, %c0_i32, %arg2 : i32, i32, i32
  }
  func.func @transform_3(%arg0: i32, %arg1: i32, %arg2: i32) -> (i32, i32, i32) {
    %c0_i32 = arith.constant 0 : i32
    return %arg0, %arg1, %arg2 : i32, i32, i32
  }
}

module attributes {stable_mosaic.version = 11 : i64} {
  func.func @_st_gather_kernel(%arg0: i32, %arg1: i32, %arg2: i32, %arg3: memref<1x4x256xf32, #tpu.memory_space<vmem>>, %arg4: memref<2x256xf32, #tpu.memory_space<vmem>>, %arg5: memref<1x2x256xf32, #tpu.memory_space<vmem>>, %arg6: memref<1x4x256xf32, #tpu.memory_space<vmem>>) attributes {dimension_semantics = [#tpu.dimension_semantics<parallel>, #tpu.dimension_semantics<parallel>, #tpu.dimension_semantics<parallel>], iteration_bounds = array<i64: 2, 1, 1>, scalar_prefetch = 0 : i64, scratch_operands = 0 : i64, tpu.core_type = #tpu.core_type<tc>, window_params = [{transform_indices = @transform_0, window_bounds = array<i64: 1, 4, 256>}, {transform_indices = @transform_1, window_bounds = array<i64: 2, 256>}, {transform_indices = @transform_2, window_bounds = array<i64: 1, 2, 256>}, {transform_indices = @transform_3, window_bounds = array<i64: 1, 4, 256>}]} {
    %c0 = arith.constant 0 : index
    %c0_0 = arith.constant 0 : index
    %0 = vector.load %arg4[%c0, %c0_0] : memref<2x256xf32, #tpu.memory_space<vmem>>, vector<2x256xf32>
    %c0_1 = arith.constant 0 : index
    %c0_2 = arith.constant 0 : index
    %c0_3 = arith.constant 0 : index
    %1 = vector.load %arg5[%c0_1, %c0_2, %c0_3] : memref<1x2x256xf32, #tpu.memory_space<vmem>>, vector<1x2x256xf32>
    %2 = vector.shape_cast %1 : vector<1x2x256xf32> to vector<2x256xf32>
    %3 = vector.extract_strided_slice %0 {offsets = [0, 0], sizes = [1, 256], strides = [1, 1]} : vector<2x256xf32> to vector<1x256xf32>
    %4 = vector.extract_strided_slice %0 {offsets = [1, 0], sizes = [1, 256], strides = [1, 1]} : vector<2x256xf32> to vector<1x256xf32>
    %5 = vector.extract_strided_slice %2 {offsets = [0, 0], sizes = [1, 256], strides = [1, 1]} : vector<2x256xf32> to vector<1x256xf32>
    %6 = vector.extract_strided_slice %2 {offsets = [1, 0], sizes = [1, 256], strides = [1, 1]} : vector<2x256xf32> to vector<1x256xf32>
    %7 = arith.addf %3, %5 : vector<1x256xf32>
    %cst = arith.constant 1.06666672 : f32
    %8 = vector.broadcast %cst : f32 to vector<1x256xf32>
    %9 = arith.mulf %7, %8 : vector<1x256xf32>
    %cst_4 = arith.constant 5.000000e-01 : f32
    %10 = vector.broadcast %cst_4 : f32 to vector<1x256xf32>
    %11 = arith.subf %9, %10 : vector<1x256xf32>
    %cst_5 = arith.constant 0.000000e+00 : f32
    %cst_6 = arith.constant 1.500000e+01 : f32
    %12 = vector.broadcast %cst_5 : f32 to vector<1x256xf32>
    %13 = arith.maximumf %12, %11 : vector<1x256xf32>
    %14 = vector.broadcast %cst_6 : f32 to vector<1x256xf32>
    %15 = arith.minimumf %14, %13 : vector<1x256xf32>
    %16 = arith.addf %4, %6 : vector<1x256xf32>
    %cst_7 = arith.constant 1.06666672 : f32
    %17 = vector.broadcast %cst_7 : f32 to vector<1x256xf32>
    %18 = arith.mulf %16, %17 : vector<1x256xf32>
    %cst_8 = arith.constant 5.000000e-01 : f32
    %19 = vector.broadcast %cst_8 : f32 to vector<1x256xf32>
    %20 = arith.subf %18, %19 : vector<1x256xf32>
    %cst_9 = arith.constant 0.000000e+00 : f32
    %cst_10 = arith.constant 1.500000e+01 : f32
    %21 = vector.broadcast %cst_9 : f32 to vector<1x256xf32>
    %22 = arith.maximumf %21, %20 : vector<1x256xf32>
    %23 = vector.broadcast %cst_10 : f32 to vector<1x256xf32>
    %24 = arith.minimumf %23, %22 : vector<1x256xf32>
    %25 = math.floor %15 : vector<1x256xf32>
    %26 = math.floor %24 : vector<1x256xf32>
    %27 = arith.subf %15, %25 : vector<1x256xf32>
    %28 = arith.subf %24, %26 : vector<1x256xf32>
    %29 = arith.fptosi %25 : vector<1x256xf32> to vector<1x256xi32>
    %30 = arith.fptosi %26 : vector<1x256xf32> to vector<1x256xi32>
    %c1_i32 = arith.constant 1 : i32
    %31 = vector.broadcast %c1_i32 : i32 to vector<1x256xi32>
    %32 = arith.addi %29, %31 : vector<1x256xi32>
    %c15_i32 = arith.constant 15 : i32
    %33 = vector.broadcast %c15_i32 : i32 to vector<1x256xi32>
    %34 = arith.minsi %32, %33 : vector<1x256xi32>
    %c1_i32_11 = arith.constant 1 : i32
    %35 = vector.broadcast %c1_i32_11 : i32 to vector<1x256xi32>
    %36 = arith.addi %30, %35 : vector<1x256xi32>
    %c15_i32_12 = arith.constant 15 : i32
    %37 = vector.broadcast %c15_i32_12 : i32 to vector<1x256xi32>
    %38 = arith.minsi %36, %37 : vector<1x256xi32>
    %cst_13 = arith.constant 1.000000e+00 : f32
    %39 = vector.broadcast %cst_13 : f32 to vector<1x256xf32>
    %40 = arith.subf %39, %27 : vector<1x256xf32>
    %cst_14 = arith.constant 1.000000e+00 : f32
    %41 = vector.broadcast %cst_14 : f32 to vector<1x256xf32>
    %42 = arith.subf %41, %28 : vector<1x256xf32>
    %43 = arith.mulf %40, %42 : vector<1x256xf32>
    %cst_15 = arith.constant 1.000000e+00 : f32
    %44 = vector.broadcast %cst_15 : f32 to vector<1x256xf32>
    %45 = arith.subf %44, %27 : vector<1x256xf32>
    %46 = arith.mulf %45, %28 : vector<1x256xf32>
    %cst_16 = arith.constant 1.000000e+00 : f32
    %47 = vector.broadcast %cst_16 : f32 to vector<1x256xf32>
    %48 = arith.subf %47, %28 : vector<1x256xf32>
    %49 = arith.mulf %27, %48 : vector<1x256xf32>
    %50 = arith.mulf %27, %28 : vector<1x256xf32>
    %c16_i32 = arith.constant 16 : i32
    %51 = vector.broadcast %c16_i32 : i32 to vector<1x256xi32>
    %52 = arith.muli %29, %51 : vector<1x256xi32>
    %53 = arith.addi %52, %30 : vector<1x256xi32>
    %c16_i32_17 = arith.constant 16 : i32
    %54 = vector.broadcast %c16_i32_17 : i32 to vector<1x256xi32>
    %55 = arith.muli %29, %54 : vector<1x256xi32>
    %56 = arith.addi %55, %38 : vector<1x256xi32>
    %c16_i32_18 = arith.constant 16 : i32
    %57 = vector.broadcast %c16_i32_18 : i32 to vector<1x256xi32>
    %58 = arith.muli %34, %57 : vector<1x256xi32>
    %59 = arith.addi %58, %30 : vector<1x256xi32>
    %c16_i32_19 = arith.constant 16 : i32
    %60 = vector.broadcast %c16_i32_19 : i32 to vector<1x256xi32>
    %61 = arith.muli %34, %60 : vector<1x256xi32>
    %62 = arith.addi %61, %38 : vector<1x256xi32>
    %c0_20 = arith.constant 0 : index
    %c0_21 = arith.constant 0 : index
    %c0_22 = arith.constant 0 : index
    %63 = vector.load %arg3[%c0_20, %c0_21, %c0_22] : memref<1x4x256xf32, #tpu.memory_space<vmem>>, vector<1x4x256xf32>
    %64 = vector.shape_cast %63 : vector<1x4x256xf32> to vector<4x256xf32>
    %65 = vector.shape_cast %53 : vector<1x256xi32> to vector<1x256xi32>
    %66 = vector.broadcast %65 : vector<1x256xi32> to vector<4x256xi32>
    %67 = vector.shape_cast %66 : vector<4x256xi32> to vector<4x256x1xi32>
    %68 = vector.shape_cast %67 : vector<4x256x1xi32> to vector<4x256xi32>
    %69 = tpu.dynamic_gather %64[%68] in [1] : vector<4x256xf32>, vector<4x256xi32> -> vector<4x256xf32>
    %70 = vector.broadcast %43 : vector<1x256xf32> to vector<4x256xf32>
    %71 = arith.mulf %70, %69 : vector<4x256xf32>
    %72 = vector.shape_cast %56 : vector<1x256xi32> to vector<1x256xi32>
    %73 = vector.broadcast %72 : vector<1x256xi32> to vector<4x256xi32>
    %74 = vector.shape_cast %73 : vector<4x256xi32> to vector<4x256x1xi32>
    %75 = vector.shape_cast %74 : vector<4x256x1xi32> to vector<4x256xi32>
    %76 = tpu.dynamic_gather %64[%75] in [1] : vector<4x256xf32>, vector<4x256xi32> -> vector<4x256xf32>
    %77 = vector.broadcast %46 : vector<1x256xf32> to vector<4x256xf32>
    %78 = arith.mulf %77, %76 : vector<4x256xf32>
    %79 = arith.addf %71, %78 : vector<4x256xf32>
    %80 = vector.shape_cast %59 : vector<1x256xi32> to vector<1x256xi32>
    %81 = vector.broadcast %80 : vector<1x256xi32> to vector<4x256xi32>
    %82 = vector.shape_cast %81 : vector<4x256xi32> to vector<4x256x1xi32>
    %83 = vector.shape_cast %82 : vector<4x256x1xi32> to vector<4x256xi32>
    %84 = tpu.dynamic_gather %64[%83] in [1] : vector<4x256xf32>, vector<4x256xi32> -> vector<4x256xf32>
    %85 = vector.broadcast %49 : vector<1x256xf32> to vector<4x256xf32>
    %86 = arith.mulf %85, %84 : vector<4x256xf32>
    %87 = arith.addf %79, %86 : vector<4x256xf32>
    %88 = vector.shape_cast %62 : vector<1x256xi32> to vector<1x256xi32>
    %89 = vector.broadcast %88 : vector<1x256xi32> to vector<4x256xi32>
    %90 = vector.shape_cast %89 : vector<4x256xi32> to vector<4x256x1xi32>
    %91 = vector.shape_cast %90 : vector<4x256x1xi32> to vector<4x256xi32>
    %92 = tpu.dynamic_gather %64[%91] in [1] : vector<4x256xf32>, vector<4x256xi32> -> vector<4x256xf32>
    %93 = vector.broadcast %50 : vector<1x256xf32> to vector<4x256xf32>
    %94 = arith.mulf %93, %92 : vector<4x256xf32>
    %95 = arith.addf %87, %94 : vector<4x256xf32>
    %c0_23 = arith.constant 0 : index
    %c0_24 = arith.constant 0 : index
    %c0_25 = arith.constant 0 : index
    %96 = vector.load %arg6[%c0_23, %c0_24, %c0_25] : memref<1x4x256xf32, #tpu.memory_space<vmem>>, vector<1x4x256xf32>
    %97 = vector.shape_cast %96 : vector<1x4x256xf32> to vector<4x256xf32>
    %98 = vector.shape_cast %95 : vector<4x256xf32> to vector<1x4x256xf32>
    tpu.vector_store %arg6[%c0_23, %c0_24, %c0_25], %98 {strides = array<i32>} : memref<1x4x256xf32, #tpu.memory_space<vmem>>, vector<1x4x256xf32>,
    return
  }
  func.func @transform_0(%arg0: i32, %arg1: i32, %arg2: i32) -> (i32, i32, i32) {
    %c0_i32 = arith.constant 0 : i32
    %c0_i32_0 = arith.constant 0 : i32
    return %arg0, %arg1, %c0_i32 : i32, i32, i32
  }
  func.func @transform_1(%arg0: i32, %arg1: i32, %arg2: i32) -> (i32, i32) {
    %c0_i32 = arith.constant 0 : i32
    %c0_i32_0 = arith.constant 0 : i32
    return %c0_i32, %arg2 : i32, i32
  }
  func.func @transform_2(%arg0: i32, %arg1: i32, %arg2: i32) -> (i32, i32, i32) {
    %c0_i32 = arith.constant 0 : i32
    %c0_i32_0 = arith.constant 0 : i32
    return %arg0, %c0_i32, %arg2 : i32, i32, i32
  }
  func.func @transform_3(%arg0: i32, %arg1: i32, %arg2: i32) -> (i32, i32, i32) {
    %c0_i32 = arith.constant 0 : i32
    return %arg0, %arg1, %arg2 : i32, i32, i32
  }
}

module attributes {stable_mosaic.version = 11 : i64} {
  func.func @_st_onehot_matmul_kernel(%arg0: i32, %arg1: i32, %arg2: i32, %arg3: memref<1x4x256xf32, #tpu.memory_space<vmem>>, %arg4: memref<2x256xf32, #tpu.memory_space<vmem>>, %arg5: memref<1x2x256xf32, #tpu.memory_space<vmem>>, %arg6: memref<1x4x256xf32, #tpu.memory_space<vmem>>, %arg7: memref<4x256xf32, #tpu.memory_space<vmem>>, %arg8: memref<4x256xi32, #tpu.memory_space<vmem>>, %arg9: memref<4x256xf32, #tpu.memory_space<vmem>>) attributes {dimension_semantics = [#tpu.dimension_semantics<parallel>, #tpu.dimension_semantics<parallel>, #tpu.dimension_semantics<arbitrary>], iteration_bounds = array<i64: 2, 1, 1>, scalar_prefetch = 0 : i64, scratch_operands = 3 : i64, tpu.core_type = #tpu.core_type<tc>, window_params = [{transform_indices = @transform_0, window_bounds = array<i64: 1, 4, 256>}, {transform_indices = @transform_1, window_bounds = array<i64: 2, 256>}, {transform_indices = @transform_2, window_bounds = array<i64: 1, 2, 256>}, {transform_indices = @transform_3, window_bounds = array<i64: 1, 4, 256>}]} {
    %c0_i32 = arith.constant 0 : i32
    %0 = arith.cmpi eq, %arg2, %c0_i32 : i32
    %1 = arith.extui %0 : i1 to i32
    %c0_i32_0 = arith.constant 0 : i32
    %2 = arith.cmpi ne, %1, %c0_i32_0 : i32
    scf.if %2 {
      %cst_26 = arith.constant 0.000000e+00 : f32
      %51 = vector.broadcast %cst_26 : f32 to vector<4x256xf32>
      %c0_27 = arith.constant 0 : index
      %c0_28 = arith.constant 0 : index
      %52 = vector.load %arg7[%c0_27, %c0_28] : memref<4x256xf32, #tpu.memory_space<vmem>>, vector<4x256xf32>
      tpu.vector_store %arg7[%c0_27, %c0_28], %51 {strides = array<i32>} : memref<4x256xf32, #tpu.memory_space<vmem>>, vector<4x256xf32>,
      %c0_29 = arith.constant 0 : index
      %c0_30 = arith.constant 0 : index
      %53 = vector.load %arg4[%c0_29, %c0_30] : memref<2x256xf32, #tpu.memory_space<vmem>>, vector<2x256xf32>
      %c0_31 = arith.constant 0 : index
      %c0_32 = arith.constant 0 : index
      %c0_33 = arith.constant 0 : index
      %54 = vector.load %arg5[%c0_31, %c0_32, %c0_33] : memref<1x2x256xf32, #tpu.memory_space<vmem>>, vector<1x2x256xf32>
      %55 = vector.shape_cast %54 : vector<1x2x256xf32> to vector<2x256xf32>
      %56 = vector.extract_strided_slice %53 {offsets = [0, 0], sizes = [1, 256], strides = [1, 1]} : vector<2x256xf32> to vector<1x256xf32>
      %57 = vector.extract_strided_slice %53 {offsets = [1, 0], sizes = [1, 256], strides = [1, 1]} : vector<2x256xf32> to vector<1x256xf32>
      %58 = vector.extract_strided_slice %55 {offsets = [0, 0], sizes = [1, 256], strides = [1, 1]} : vector<2x256xf32> to vector<1x256xf32>
      %59 = vector.extract_strided_slice %55 {offsets = [1, 0], sizes = [1, 256], strides = [1, 1]} : vector<2x256xf32> to vector<1x256xf32>
      %60 = arith.addf %56, %58 : vector<1x256xf32>
      %cst_34 = arith.constant 1.06666672 : f32
      %61 = vector.broadcast %cst_34 : f32 to vector<1x256xf32>
      %62 = arith.mulf %60, %61 : vector<1x256xf32>
      %cst_35 = arith.constant 5.000000e-01 : f32
      %63 = vector.broadcast %cst_35 : f32 to vector<1x256xf32>
      %64 = arith.subf %62, %63 : vector<1x256xf32>
      %cst_36 = arith.constant 0.000000e+00 : f32
      %cst_37 = arith.constant 1.500000e+01 : f32
      %65 = vector.broadcast %cst_36 : f32 to vector<1x256xf32>
      %66 = arith.maximumf %65, %64 : vector<1x256xf32>
      %67 = vector.broadcast %cst_37 : f32 to vector<1x256xf32>
      %68 = arith.minimumf %67, %66 : vector<1x256xf32>
      %69 = arith.addf %57, %59 : vector<1x256xf32>
      %cst_38 = arith.constant 1.06666672 : f32
      %70 = vector.broadcast %cst_38 : f32 to vector<1x256xf32>
      %71 = arith.mulf %69, %70 : vector<1x256xf32>
      %cst_39 = arith.constant 5.000000e-01 : f32
      %72 = vector.broadcast %cst_39 : f32 to vector<1x256xf32>
      %73 = arith.subf %71, %72 : vector<1x256xf32>
      %cst_40 = arith.constant 0.000000e+00 : f32
      %cst_41 = arith.constant 1.500000e+01 : f32
      %74 = vector.broadcast %cst_40 : f32 to vector<1x256xf32>
      %75 = arith.maximumf %74, %73 : vector<1x256xf32>
      %76 = vector.broadcast %cst_41 : f32 to vector<1x256xf32>
      %77 = arith.minimumf %76, %75 : vector<1x256xf32>
      %78 = math.floor %68 : vector<1x256xf32>
      %79 = math.floor %77 : vector<1x256xf32>
      %80 = arith.subf %68, %78 : vector<1x256xf32>
      %81 = arith.subf %77, %79 : vector<1x256xf32>
      %82 = arith.fptosi %78 : vector<1x256xf32> to vector<1x256xi32>
      %83 = arith.fptosi %79 : vector<1x256xf32> to vector<1x256xi32>
      %c1_i32 = arith.constant 1 : i32
      %84 = vector.broadcast %c1_i32 : i32 to vector<1x256xi32>
      %85 = arith.addi %82, %84 : vector<1x256xi32>
      %c15_i32 = arith.constant 15 : i32
      %86 = vector.broadcast %c15_i32 : i32 to vector<1x256xi32>
      %87 = arith.minsi %85, %86 : vector<1x256xi32>
      %c1_i32_42 = arith.constant 1 : i32
      %88 = vector.broadcast %c1_i32_42 : i32 to vector<1x256xi32>
      %89 = arith.addi %83, %88 : vector<1x256xi32>
      %c15_i32_43 = arith.constant 15 : i32
      %90 = vector.broadcast %c15_i32_43 : i32 to vector<1x256xi32>
      %91 = arith.minsi %89, %90 : vector<1x256xi32>
      %cst_44 = arith.constant 1.000000e+00 : f32
      %92 = vector.broadcast %cst_44 : f32 to vector<1x256xf32>
      %93 = arith.subf %92, %80 : vector<1x256xf32>
      %cst_45 = arith.constant 1.000000e+00 : f32
      %94 = vector.broadcast %cst_45 : f32 to vector<1x256xf32>
      %95 = arith.subf %94, %81 : vector<1x256xf32>
      %96 = arith.mulf %93, %95 : vector<1x256xf32>
      %cst_46 = arith.constant 1.000000e+00 : f32
      %97 = vector.broadcast %cst_46 : f32 to vector<1x256xf32>
      %98 = arith.subf %97, %80 : vector<1x256xf32>
      %99 = arith.mulf %98, %81 : vector<1x256xf32>
      %cst_47 = arith.constant 1.000000e+00 : f32
      %100 = vector.broadcast %cst_47 : f32 to vector<1x256xf32>
      %101 = arith.subf %100, %81 : vector<1x256xf32>
      %102 = arith.mulf %80, %101 : vector<1x256xf32>
      %103 = arith.mulf %80, %81 : vector<1x256xf32>
      %c16_i32 = arith.constant 16 : i32
      %104 = vector.broadcast %c16_i32 : i32 to vector<1x256xi32>
      %105 = arith.muli %82, %104 : vector<1x256xi32>
      %106 = arith.addi %105, %83 : vector<1x256xi32>
      %c16_i32_48 = arith.constant 16 : i32
      %107 = vector.broadcast %c16_i32_48 : i32 to vector<1x256xi32>
      %108 = arith.muli %82, %107 : vector<1x256xi32>
      %109 = arith.addi %108, %91 : vector<1x256xi32>
      %c16_i32_49 = arith.constant 16 : i32
      %110 = vector.broadcast %c16_i32_49 : i32 to vector<1x256xi32>
      %111 = arith.muli %87, %110 : vector<1x256xi32>
      %112 = arith.addi %111, %83 : vector<1x256xi32>
      %c16_i32_50 = arith.constant 16 : i32
      %113 = vector.broadcast %c16_i32_50 : i32 to vector<1x256xi32>
      %114 = arith.muli %87, %113 : vector<1x256xi32>
      %115 = arith.addi %114, %91 : vector<1x256xi32>
      %c0_51 = arith.constant 0 : index
      %c0_52 = arith.constant 0 : index
      %116 = vector.load %arg8[%c0_51, %c0_52] : memref<4x256xi32, #tpu.memory_space<vmem>>, vector<1x256xi32>
      tpu.vector_store %arg8[%c0_51, %c0_52], %106 {strides = array<i32>} : memref<4x256xi32, #tpu.memory_space<vmem>>, vector<1x256xi32>,
      %c1_53 = arith.constant 1 : index
      %c0_54 = arith.constant 0 : index
      %117 = vector.load %arg8[%c1_53, %c0_54] : memref<4x256xi32, #tpu.memory_space<vmem>>, vector<1x256xi32>
      tpu.vector_store %arg8[%c1_53, %c0_54], %109 {strides = array<i32>} : memref<4x256xi32, #tpu.memory_space<vmem>>, vector<1x256xi32>,
      %c2_55 = arith.constant 2 : index
      %c0_56 = arith.constant 0 : index
      %118 = vector.load %arg8[%c2_55, %c0_56] : memref<4x256xi32, #tpu.memory_space<vmem>>, vector<1x256xi32>
      tpu.vector_store %arg8[%c2_55, %c0_56], %112 {strides = array<i32>} : memref<4x256xi32, #tpu.memory_space<vmem>>, vector<1x256xi32>,
      %c3_57 = arith.constant 3 : index
      %c0_58 = arith.constant 0 : index
      %119 = vector.load %arg8[%c3_57, %c0_58] : memref<4x256xi32, #tpu.memory_space<vmem>>, vector<1x256xi32>
      tpu.vector_store %arg8[%c3_57, %c0_58], %115 {strides = array<i32>} : memref<4x256xi32, #tpu.memory_space<vmem>>, vector<1x256xi32>,
      %c0_59 = arith.constant 0 : index
      %c0_60 = arith.constant 0 : index
      %120 = vector.load %arg9[%c0_59, %c0_60] : memref<4x256xf32, #tpu.memory_space<vmem>>, vector<1x256xf32>
      tpu.vector_store %arg9[%c0_59, %c0_60], %96 {strides = array<i32>} : memref<4x256xf32, #tpu.memory_space<vmem>>, vector<1x256xf32>,
      %c1_61 = arith.constant 1 : index
      %c0_62 = arith.constant 0 : index
      %121 = vector.load %arg9[%c1_61, %c0_62] : memref<4x256xf32, #tpu.memory_space<vmem>>, vector<1x256xf32>
      tpu.vector_store %arg9[%c1_61, %c0_62], %99 {strides = array<i32>} : memref<4x256xf32, #tpu.memory_space<vmem>>, vector<1x256xf32>,
      %c2_63 = arith.constant 2 : index
      %c0_64 = arith.constant 0 : index
      %122 = vector.load %arg9[%c2_63, %c0_64] : memref<4x256xf32, #tpu.memory_space<vmem>>, vector<1x256xf32>
      tpu.vector_store %arg9[%c2_63, %c0_64], %102 {strides = array<i32>} : memref<4x256xf32, #tpu.memory_space<vmem>>, vector<1x256xf32>,
      %c3_65 = arith.constant 3 : index
      %c0_66 = arith.constant 0 : index
      %123 = vector.load %arg9[%c3_65, %c0_66] : memref<4x256xf32, #tpu.memory_space<vmem>>, vector<1x256xf32>
      tpu.vector_store %arg9[%c3_65, %c0_66], %103 {strides = array<i32>} : memref<4x256xf32, #tpu.memory_space<vmem>>, vector<1x256xf32>,
    } else {
    }
    %c256_i32 = arith.constant 256 : i32
    %3 = arith.muli %arg2, %c256_i32 : i32
    %4 = tpu.iota {dimensions = array<i32: 0>} : vector<256x256xi32>
    %5 = vector.broadcast %3 : i32 to vector<256x256xi32>
    %6 = arith.addi %5, %4 : vector<256x256xi32>
    %c0 = arith.constant 0 : index
    %c0_1 = arith.constant 0 : index
    %7 = vector.load %arg8[%c0, %c0_1] : memref<4x256xi32, #tpu.memory_space<vmem>>, vector<1x256xi32>
    %8 = vector.broadcast %7 : vector<1x256xi32> to vector<256x256xi32>
    %9 = arith.cmpi eq, %6, %8 : vector<256x256xi32>
    %c0_2 = arith.constant 0 : index
    %c0_3 = arith.constant 0 : index
    %10 = vector.load %arg9[%c0_2, %c0_3] : memref<4x256xf32, #tpu.memory_space<vmem>>, vector<1x256xf32>
    %cst = arith.constant 0.000000e+00 : f32
    %11 = vector.shape_cast %10 : vector<1x256xf32> to vector<1x256xf32>
    %12 = vector.broadcast %11 : vector<1x256xf32> to vector<256x256xf32>
    %13 = vector.broadcast %cst : f32 to vector<256x256xf32>
    %14 = arith.select %9, %12, %13 : vector<256x256xi1>, vector<256x256xf32>
    %c1 = arith.constant 1 : index
    %c0_4 = arith.constant 0 : index
    %15 = vector.load %arg8[%c1, %c0_4] : memref<4x256xi32, #tpu.memory_space<vmem>>, vector<1x256xi32>
    %16 = vector.broadcast %15 : vector<1x256xi32> to vector<256x256xi32>
    %17 = arith.cmpi eq, %6, %16 : vector<256x256xi32>
    %c1_5 = arith.constant 1 : index
    %c0_6 = arith.constant 0 : index
    %18 = vector.load %arg9[%c1_5, %c0_6] : memref<4x256xf32, #tpu.memory_space<vmem>>, vector<1x256xf32>
    %cst_7 = arith.constant 0.000000e+00 : f32
    %19 = vector.shape_cast %18 : vector<1x256xf32> to vector<1x256xf32>
    %20 = vector.broadcast %19 : vector<1x256xf32> to vector<256x256xf32>
    %21 = vector.broadcast %cst_7 : f32 to vector<256x256xf32>
    %22 = arith.select %17, %20, %21 : vector<256x256xi1>, vector<256x256xf32>
    %23 = arith.addf %14, %22 : vector<256x256xf32>
    %c2 = arith.constant 2 : index
    %c0_8 = arith.constant 0 : index
    %24 = vector.load %arg8[%c2, %c0_8] : memref<4x256xi32, #tpu.memory_space<vmem>>, vector<1x256xi32>
    %25 = vector.broadcast %24 : vector<1x256xi32> to vector<256x256xi32>
    %26 = arith.cmpi eq, %6, %25 : vector<256x256xi32>
    %c2_9 = arith.constant 2 : index
    %c0_10 = arith.constant 0 : index
    %27 = vector.load %arg9[%c2_9, %c0_10] : memref<4x256xf32, #tpu.memory_space<vmem>>, vector<1x256xf32>
    %cst_11 = arith.constant 0.000000e+00 : f32
    %28 = vector.shape_cast %27 : vector<1x256xf32> to vector<1x256xf32>
    %29 = vector.broadcast %28 : vector<1x256xf32> to vector<256x256xf32>
    %30 = vector.broadcast %cst_11 : f32 to vector<256x256xf32>
    %31 = arith.select %26, %29, %30 : vector<256x256xi1>, vector<256x256xf32>
    %32 = arith.addf %23, %31 : vector<256x256xf32>
    %c3 = arith.constant 3 : index
    %c0_12 = arith.constant 0 : index
    %33 = vector.load %arg8[%c3, %c0_12] : memref<4x256xi32, #tpu.memory_space<vmem>>, vector<1x256xi32>
    %34 = vector.broadcast %33 : vector<1x256xi32> to vector<256x256xi32>
    %35 = arith.cmpi eq, %6, %34 : vector<256x256xi32>
    %c3_13 = arith.constant 3 : index
    %c0_14 = arith.constant 0 : index
    %36 = vector.load %arg9[%c3_13, %c0_14] : memref<4x256xf32, #tpu.memory_space<vmem>>, vector<1x256xf32>
    %cst_15 = arith.constant 0.000000e+00 : f32
    %37 = vector.shape_cast %36 : vector<1x256xf32> to vector<1x256xf32>
    %38 = vector.broadcast %37 : vector<1x256xf32> to vector<256x256xf32>
    %39 = vector.broadcast %cst_15 : f32 to vector<256x256xf32>
    %40 = arith.select %35, %38, %39 : vector<256x256xi1>, vector<256x256xf32>
    %41 = arith.addf %32, %40 : vector<256x256xf32>
    %c0_16 = arith.constant 0 : index
    %c0_17 = arith.constant 0 : index
    %42 = vector.load %arg7[%c0_16, %c0_17] : memref<4x256xf32, #tpu.memory_space<vmem>>, vector<4x256xf32>
    %c0_18 = arith.constant 0 : index
    %c0_19 = arith.constant 0 : index
    %c0_20 = arith.constant 0 : index
    %43 = vector.load %arg3[%c0_18, %c0_19, %c0_20] : memref<1x4x256xf32, #tpu.memory_space<vmem>>, vector<1x4x256xf32>
    %44 = vector.shape_cast %43 : vector<1x4x256xf32> to vector<4x256xf32>
    %cst_21 = arith.constant dense<0.000000e+00> : vector<4x256xf32>
    %45 = tpu.matmul %44, %41, %cst_21 {dimension_numbers = #tpu.dot_dimension_numbers<[1], [0], [0], [1], [0, 0, 1, 1], [], []>} : vector<4x256xf32>, vector<256x256xf32>, vector<4x256xf32> -> vector<4x256xf32>
    %46 = arith.addf %42, %45 : vector<4x256xf32>
    %c0_22 = arith.constant 0 : index
    %c0_23 = arith.constant 0 : index
    %47 = vector.load %arg7[%c0_22, %c0_23] : memref<4x256xf32, #tpu.memory_space<vmem>>, vector<4x256xf32>
    tpu.vector_store %arg7[%c0_22, %c0_23], %46 {strides = array<i32>} : memref<4x256xf32, #tpu.memory_space<vmem>>, vector<4x256xf32>,
    %c0_i32_24 = arith.constant 0 : i32
    %48 = arith.cmpi eq, %arg2, %c0_i32_24 : i32
    %49 = arith.extui %48 : i1 to i32
    %c0_i32_25 = arith.constant 0 : i32
    %50 = arith.cmpi ne, %49, %c0_i32_25 : i32
    scf.if %50 {
      %c0_26 = arith.constant 0 : index
      %c0_27 = arith.constant 0 : index
      %51 = vector.load %arg7[%c0_26, %c0_27] : memref<4x256xf32, #tpu.memory_space<vmem>>, vector<4x256xf32>
      %c0_28 = arith.constant 0 : index
      %c0_29 = arith.constant 0 : index
      %c0_30 = arith.constant 0 : index
      %52 = vector.load %arg6[%c0_28, %c0_29, %c0_30] : memref<1x4x256xf32, #tpu.memory_space<vmem>>, vector<1x4x256xf32>
      %53 = vector.shape_cast %52 : vector<1x4x256xf32> to vector<4x256xf32>
      %54 = vector.shape_cast %51 : vector<4x256xf32> to vector<1x4x256xf32>
      tpu.vector_store %arg6[%c0_28, %c0_29, %c0_30], %54 {strides = array<i32>} : memref<1x4x256xf32, #tpu.memory_space<vmem>>, vector<1x4x256xf32>,
    } else {
    }
    return
  }
  func.func @transform_0(%arg0: i32, %arg1: i32, %arg2: i32) -> (i32, i32, i32) {
    %c0_i32 = arith.constant 0 : i32
    %c0_i32_0 = arith.constant 0 : i32
    return %arg0, %c0_i32, %arg2 : i32, i32, i32
  }
  func.func @transform_1(%arg0: i32, %arg1: i32, %arg2: i32) -> (i32, i32) {
    %c0_i32 = arith.constant 0 : i32
    %c0_i32_0 = arith.constant 0 : i32
    return %c0_i32, %arg1 : i32, i32
  }
  func.func @transform_2(%arg0: i32, %arg1: i32, %arg2: i32) -> (i32, i32, i32) {
    %c0_i32 = arith.constant 0 : i32
    %c0_i32_0 = arith.constant 0 : i32
    return %arg0, %c0_i32, %arg1 : i32, i32, i32
  }
  func.func @transform_3(%arg0: i32, %arg1: i32, %arg2: i32) -> (i32, i32, i32) {
    %c0_i32 = arith.constant 0 : i32
    %c0_i32_0 = arith.constant 0 : i32
    return %arg0, %c0_i32, %arg1 : i32, i32, i32
  }
}

</mosaic_0001>

<bundles_post_ra>
// kernel: call.1
= control target key start
LH: loop header
LB: loop body
LE: loop exit
PB: predicated region body
PF: predicated region fallthrough
CT: control target
= control target key end

     0   :  { %8 = vsyncpa [#allocation6], 0  ;;  %s3019_s0 = inlined_call_operand.hbm [shape: f32[2,4,256], index: 0, kind: input, shape index: {}]   ;;  %s3020_s1 = inlined_call_operand.hbm [shape: f32[2,256], index: 1, kind: input, shape index: {}]   ;;  %s3021_s2 = inlined_call_operand.hbm [shape: f32[2,2,256], index: 2, kind: input, shape index: {}]   ;;  %s3022_s3 = inlined_call_operand.hbm [shape: f32[2,4,256], index: 3, kind: output, shape index: {}]  }
   0x1   :  { %10 = vsyncpa [#allocation6 + $0x1], 0 }
   0x2   :  { %11 = vsyncpa [#allocation9], 0 }
   0x3   :  { %12 = vsyncpa [#allocation7], 0 }
   0x4   :  { %14 = vsyncpa [#allocation7 + $0x1], 0  ;;  %s1763_s12 = smov 0   ;;  %s1765_s13 = smov 0  }
   0x5   :  { %s1767_s14 = smov 0   ;;  %s1769_s15 = smov 0  }
   0x6   :  { %s1771_s16 = smov 0   ;;  %s1773_s17 = smov 0  }
   0x7 LB: > { %s39_s18 = sadd.s32 1, %s1736_s16  ;;  %s48_s19 = sadd.s32 1, %s1728_s14  ;;  %s1740_s17 = sphi %s1773_s17, %s20_s17   ;;  %s1736_s16 = sphi %s1771_s16, %s3035_s16   ;;  %s1732_s15 = sphi %s1769_s15, %s3034_s15   ;;  %s1728_s14 = sphi %s1767_s14, %s3033_s14   ;;  %s1724_s13 = sphi %s1765_s13, %s3032_s13   ;;  %s1720_s12 = sphi %s1763_s12, %s3031_s12  }
   0x8   : > { %p41_p0 = scmp.ge.s32.totalorder %s39_s18, 2  ;;  %p55_p1 = scmp.ne.s32.totalorder %s1728_s14, %s1724_s13 }
   0x9   : > { %p56_p2 = scmp.eq.s32.totalorder %s1740_s17, 0  ;;  %p1459_p3 = scmp.ge.s32.totalorder %s1740_s17, 2 }
   0xa   : > { %s3037_s18 = smov (%p41_p0, %s39_s18), 0  ;;  %p1508_p5 = scmp.lt.s32.totalorder %s1740_s17, 2 }
   0xb   : > { %p1804_p4 = por %p56_p2, %p55_p1  ;;  %s43_s21 = ssub.s32 %s1736_s16, %s3037_s18 }
   0xc   : > { %s182_s22 = sand.u32 1, %s1740_s17   ;;  %p46_p6 = scmp.eq.s32.totalorder %s43_s21, 0 }
   0xd   : > { %s184_s23 = sand.u32 1, %s1728_s14   ;;  %s1477_s24 = sshll.u32 %s1736_s16, 3 }
   0xe   : > { %s1815_s25 = scalar_select %p46_p6, %s1728_s14, %s48_s19  }
   0xf   : > { %s1460_s26 = sshll.u32 %s184_s23, 3  ;;  %s193_s29 = scalar_lea.hbm %s3019_s0, %s1477_s24 }
  0x10   : > { %s195_s30 = sshll.u32 %s193_s29, 4  ;;  %s186_s4 = scalar_lea.vmem [#allocation5], %s1460_s26  ;;  %s196_s30 = int_to_ptr.hbm [resolvable:$true] %s195_s30 }
  0x11   : > { %s197_s5 = sshll.u32 %s186_s4, 4  ;;  %p1824_p7 = pnand %p1508_p5, %p1804_p4  ;;  %s198_s5 = int_to_ptr.vmem [resolvable:$true] %s197_s5 }
  0x12   : > { %s1463_s7 = sshll.u32 %s184_s23, 2  ;;  %s1828_s8 = scalar_lea.sflag [#allocation6], %s182_s22 }
  0x13   : > { %1499 = dma.hbm_to_vmem [thread:$0]  (!%p1824_p7), %s196_s30, 128, %s198_s5, %s1828_s8  }
  0x14   : > { %s1834_s9 = sadd.s32 4294967295, %s1740_s17   ;;  %s1456_s10 = sadd.s32 4294967294, %s1740_s17  }
  0x15   : > { %p61_p8 = scmp.ne.s32.totalorder %s1724_s13, %s1720_s12  ;;  %p62_p9 = scmp.eq.s32.totalorder %s1834_s9, 0 }
  0x16   : > { %p141_p10 = scmp.eq.s32.totalorder %s1834_s9, 1  ;;  %p147_p11 = scmp.eq.s32.totalorder %s1456_s10, 1 }
  0x17   : > { %p1843_p12 = por %p62_p9, %p61_p8  ;;  %p1457_p13 = scmp.ge.s32.totalorder %s1740_s17, 1 }
  0x18   : > { %p1851_p0 = por %p141_p10, %p55_p1  ;;  %p1855_p2 = por %p147_p11, %p61_p8 }
  0x19   : > { %p154_p4 = scmp.lt.s32.totalorder %s1740_s17, 3  ;;  %s169_s23 = sshll.u32 %s3020_s1, 4  ;;  %s170_s23 = int_to_ptr.hbm [resolvable:$true] %s169_s23 }
  0x1a   : > { %s1742_s26 = smov [#allocation8]   ;;  %s1478_s28 = sshll.u32 %s1736_s16, 2 }
  0x1b   : > { %p1863_p5 = pnand %p1457_p13, %p154_p4  ;;  %s171_s27 = sshll.u32 %s1742_s26, 4  ;;  %s172_s27 = int_to_ptr.vmem [resolvable:$true] %s171_s27 }
  0x1c   : > { %s208_s29 = scalar_lea.vmem [#allocation10], %s1463_s7  ;;  %s215_s10 = scalar_lea.hbm %s3021_s2, %s1478_s28 }
  0x1d   : > { %p1492_p1 = pneg %p1863_p5  ;;  %s219_s30 = sshll.u32 %s208_s29, 4  ;;  %s220_s30 = int_to_ptr.vmem [resolvable:$true] %s219_s30 }
  0x1e   : > { %s217_s21 = sshll.u32 %s215_s10, 4  ;;  %228 = sbr.rel (%p1863_p5) target bundleno = 402 (0x192), region = 32  ;;  %s218_s21 = int_to_ptr.hbm [resolvable:$true] %s217_s21 }
  0x1f   : > { %p1493_p6 = pnand %p1492_p1, %p62_p9  ;;  %s230_s7 = sand.u32 (!%p1863_p5), 1, %s1834_s9  }
  0x20   : > { %1502 = dma.hbm_to_vmem [thread:$0]  (!%p1824_p7), %s218_s21, 64, %s220_s30, %s1828_s8  }
  0x21   : > { %1495 = dma.hbm_to_vmem [thread:$0]  (!%p1493_p6), %s170_s23, 64, %s172_s27, [#allocation9]  }
  0x22   : > { %s1882_s22 = sand.u32 (!%p1863_p5), 1, %s1724_s13   ;;  %s231_s29 = scalar_lea.sflag (!%p1863_p5), [#allocation6], %s230_s7 }
  0x23   : > { %s1467_s26 = sshll.u32 %s1882_s22, 3 }
  0x24   : > { %s1887_s28 = scalar_lea.vmem [#allocation5], %s1467_s26 }
  0x25   : > { %1703 = dma.done.wait (%p1843_p12), %s231_s29, 128  }
  0x26   : > { %1705 = vsyncadd (%p1843_p12), %s231_s29, 4294967168 }
  0x27   : > { %1707 = dma.done.wait (%p62_p9), [#allocation9], 64  }
  0x28   : > { %1709 = vsyncadd (%p62_p9), [#allocation9], 4294967232  ;;  %s1469_s6 = sshll.u32 %s1882_s22, 2 }
  0x29   : > { %s249_s8 = scalar_lea.vmem [#allocation10], %s1469_s6 }
  0x2a   : > { %1711 = dma.done.wait (%p1843_p12), %s231_s29, 64  }
  0x2b   : > { %1713 = vsyncadd (%p1843_p12), %s231_s29, 4294967232  ;;  %v287_v0 = vld [vmem:[#allocation8] sm:$0xf]  ;;  %v288_v1 = vld [vmem:[%s249_s8] sm:$0xf]  ;;  %v332_v7 = vlaneseq  ;;  %vm326_vm0 = vcmask 1040384  }
  0x2c   : > { %v289_v2 = vadd.f32 %v288_v1, %v287_v0  ;;  %vm328_vm1 = vcmask 1042434   ;;  %vm330_vm2 = vcmask 1041408   ;;  %s1479_s9 = sshll.u32 %s1732_s15, 3  ;;  %s277_s27 = scalar_lea.vmem [#allocation11], %s1467_s26 }
  0x2d   : > { %v1902_v9 = vshrl.u32 %v332_v7, 7  ;;  %vm1904_vm3 = vcmp.lt.s32.totalorder %v332_v7, 256  ;;  %s1328_s24 = scalar_lea.hbm %s3022_s3, %s1479_s9  ;;  %s1330_s30 = sshll.u32 %s277_s27, 4  ;;  %s1331_s30 = int_to_ptr.vmem [resolvable:$true] %s1330_s30 }
  0x2e   : > { %v290_v3 = vmul.f32 1.0666667, %v289_v2  ;;  %s1332_s4 = sshll.u32 %s1328_s24, 4  ;;  %s1315_s15 = scalar_lea.sflag [#allocation7], %s1882_s22  ;;  %s1333_s4 = int_to_ptr.hbm [resolvable:$true] %s1332_s4 }
  0x2f   : > { %v1909_v18 = vadd.s32 120, %v1902_v9  ;;  %v1912_v21 = vadd.s32 248, %v1902_v9  ;;  %v1915_v24 = vadd.s32 112, %v1902_v9  ;;  %v1918_v25 = vadd.s32 240, %v1902_v9  ;;  %s1664_s5 = sshra.s32 %s1333_s4, 4  ;;  %s1670_s26 = scalar_lea.hbm %s3022_s3, 16  ;;  %s1665_s5 = int_to_ptr.hbm [resolvable:$true] %s1664_s5 }
  0x30   : > { %v1471_v4 = vadd.f32 -0.5, %v290_v3  ;;  %v1921_v29 = vadd.s32 104, %v1902_v9  ;;  %v1926_v33 = vadd.s32 232, %v1902_v9  ;;  %s1666_s10 = scalar_lea.hbm %s1665_s5, 8  ;;  %p1671_p10 = scmp.lt.s32.totalorder %s1665_s5, %s3022_s3 }
  0x31   : > { %p1667_p7 = scmp.ne.s32.totalorder %s1665_s5, %s1666_s10  ;;  %p1672_p11 = scmp.lt.s32.totalorder %s1670_s26, %s1666_s10 }
  0x32   : > { %v292_v5 = vmax.f32 %v1471_v4, 0.0 }
  0x33   : > { %p1668_p8 = pnand %p1667_p7, %p1851_p0  ;;  %p1673_p12 = por %p1672_p11, %p1671_p10 }
  0x34   : > { %v293_v6 = vmin.f32 %v292_v5, 15.0 }
  0x35   : > { %p1669_p9 = pneg %p1668_p8 }
  0x36   : > { %v294_v8 = vfloor.f32 %v293_v6 }
  0x37   : > { %p1674_p13 = pnand %p1673_p12, %p1669_p9 }
  0x38   : > { %v295_v10 = vsub.f32 %v293_v6, %v294_v8  ;;  %v1481_v11 = vcvt.f32.s32 %v294_v8 }
  0x3a   : > { %v297_v12 = vadd.s32 1, %v1481_v11  ;;  %v300_v13 = vsub.f32 1.0, %v295_v10  ;;  %v307_v14 = vrot.slane %v295_v10, 7  ;;  %v313_v15 = vmul.u32 16, %v1481_v11 }
  0x3b   : > { %v314_v16 = vrot.slane %v1481_v11, 7 }
  0x3c   : > { %vm298_vm4 = vcmp.lt.s32.totalorder %v297_v12, 15  ;;  %v302_v19 = vrot.slane %v300_v13, 7  ;;  %v308_v20 = vrot.slane %v307_v14, 2 }
  0x3d   : > { %v299_v22 = vsel %vm298_vm4, %v297_v12, 15  ;;  %v315_v23 = vrot.slane %v314_v16, 2 }
  0x3e   : > { %v303_v26 = vrot.slane %v302_v19, 2  ;;  %v310_v27 = vmul.f32 %v308_v20, %v300_v13  ;;  %v317_v28 = vrot.slane %v299_v22, 7  ;;  %v1923_v30 = vmul.f32 %v308_v20, %v295_v10 }
  0x3f   : > { %v316_v31 = vadd.s32 %v315_v23, %v313_v15  ;;  %v320_v32 = vmul.u32 16, %v299_v22 }
  0x40   : > { %v305_v34 = vmul.f32 %v303_v26, %v300_v13  ;;  %v311_v35 = vmul.f32 %v303_v26, %v295_v10  ;;  %v318_v36 = vrot.slane %v317_v28, 2  ;;  %v371_v37 = vrot.slane %v310_v27, 1 }
  0x41   : > { %v321_v38 = vadd.s32 %v320_v32, %v315_v23  ;;  %v323_v39 = vrot.slane %v316_v31, 1  ;;  %v324_v40 = vrot.slane %v316_v31, 2  ;;  %v325_v41 = vrot.slane %v316_v31, 3 }
  0x42   : > { %v319_v42 = vadd.s32 %v318_v36, %v313_v15  ;;  %v322_v43 = vadd.s32 %v320_v32, %v318_v36  ;;  %v362_v44 = vrot.slane %v305_v34, 1  ;;  %v363_v45 = vrot.slane %v305_v34, 2 }
  0x43   : > { %v327_v46 = vsel %vm326_vm0, %v316_v31, %v323_v39  ;;  %v329_v47 = vsel %vm328_vm1, %v324_v40, %v325_v41  ;;  %v345_v48 = vrot.slane %v321_v38, 1  ;;  %v346_v49 = vrot.slane %v321_v38, 2 }
  0x44   : > { %v331_v50 = vsel %vm330_vm2, %v327_v46, %v329_v47  ;;  %v337_v51 = vrot.slane %v319_v42, 1  ;;  %v338_v52 = vrot.slane %v319_v42, 2  ;;  %v339_v53 = vrot.slane %v319_v42, 3 }
  0x45   : > { %336 = vst.msk [vmem:[#allocation3] ss:$4 sm:$0x3] %vm1904_vm3, %v331_v50  ;;  %v347_v54 = vrot.slane %v321_v38, 3  ;;  %v348_v55 = vsel %vm326_vm0, %v321_v38, %v345_v48  ;;  %v353_v56 = vrot.slane %v322_v43, 1  ;;  %v354_v57 = vrot.slane %v322_v43, 2 }
  0x46   : > { %v340_v58 = vsel %vm326_vm0, %v319_v42, %v337_v51  ;;  %v341_v59 = vsel %vm328_vm1, %v338_v52, %v339_v53  ;;  %v355_v60 = vrot.slane %v322_v43, 3  ;;  %v364_v61 = vrot.slane %v305_v34, 3 }
  0x47   : > { %v342_v62 = vsel %vm330_vm2, %v340_v58, %v341_v59  ;;  %v349_v63 = vsel %vm328_vm1, %v346_v49, %v347_v54  ;;  %v356_v0 = vsel %vm326_vm0, %v322_v43, %v353_v56  ;;  %v365_v1 = vsel %vm326_vm0, %v305_v34, %v362_v44 }
  0x48   : > { %344 = vst.msk [vmem:[#allocation3 + $0x1] ss:$4 sm:$0x3] %vm1904_vm3, %v342_v62  ;;  %v350_v2 = vsel %vm330_vm2, %v348_v55, %v349_v63  ;;  %v357_v3 = vsel %vm328_vm1, %v354_v57, %v355_v60  ;;  %v366_v4 = vsel %vm328_vm1, %v363_v45, %v364_v61  ;;  %v372_v5 = vrot.slane %v310_v27, 2 }
  0x49   : > { %352 = vst.msk [vmem:[#allocation3 + $0x2] ss:$4 sm:$0x3] %vm1904_vm3, %v350_v2  ;;  %v358_v6 = vsel %vm330_vm2, %v356_v0, %v357_v3  ;;  %v367_v7 = vsel %vm330_vm2, %v365_v1, %v366_v4  ;;  %v373_v8 = vrot.slane %v310_v27, 3  ;;  %v374_v10 = vsel %vm326_vm0, %v310_v27, %v371_v37 }
  0x4a   : > { %360 = vst.msk [vmem:[#allocation3 + $0x3] ss:$4 sm:$0x3] %vm1904_vm3, %v358_v6  ;;  %v381_v11 = vrot.slane %v311_v35, 1  ;;  %v382_v12 = vrot.slane %v311_v35, 2  ;;  %v383_v13 = vrot.slane %v311_v35, 3 }
  0x4b   : > { %369 = vst.msk [vmem:[#allocation4] ss:$4 sm:$0x3] %vm1904_vm3, %v367_v7  ;;  %v375_v14 = vsel %vm328_vm1, %v372_v5, %v373_v8  ;;  %v391_v15 = vrot.slane %v1923_v30, 1  ;;  %v392_v16 = vrot.slane %v1923_v30, 2  ;;  %v393_v19 = vrot.slane %v1923_v30, 3 }
  0x4c   : > { %v376_v20 = vsel %vm330_vm2, %v374_v10, %v375_v14  ;;  %v384_v22 = vsel %vm326_vm0, %v311_v35, %v381_v11  ;;  %v385_v23 = vsel %vm328_vm1, %v382_v12, %v383_v13  ;;  %v467_v26 = vld [vmem:[#allocation3] ss:$4 sm:$0x3]  ;;  %v1962_v27 = vadd.s32 96, %v1902_v9 }
  0x4d   : > { %379 = vst.msk [vmem:[#allocation4 + $0x1] ss:$4 sm:$0x3] %vm1904_vm3, %v376_v20  ;;  %v386_v28 = vsel %vm330_vm2, %v384_v22, %v385_v23  ;;  %v394_v31 = vsel %vm326_vm0, %v1923_v30, %v391_v15  ;;  %v395_v32 = vsel %vm328_vm1, %v392_v16, %v393_v19  ;;  %v1970_v34 = vperm.slane %v467_v26, 0 }
  0x4e   : > { %389 = vst.msk [vmem:[#allocation4 + $0x2] ss:$4 sm:$0x3] %vm1904_vm3, %v386_v28  ;;  %v396_v35 = vsel %vm330_vm2, %v394_v31, %v395_v32  ;;  %v1975_v36 = vperm.slane %v467_v26, 1  ;;  %v1978_v37 = vadd.s32 224, %v1902_v9  ;;  %v1981_v38 = vadd.s32 88, %v1902_v9 }
  0x4f   : > { %399 = vst.msk [vmem:[#allocation4 + $0x3] ss:$4 sm:$0x3] %vm1904_vm3, %v396_v35  ;;  %v605_v30 = vld [vmem:[#allocation3 + $0x1] ss:$4 sm:$0x3] }
  0x50   : > { %v1985_v39 = vperm.slane %v605_v30, 0  ;;  %v1987_v40 = vperm.slane %v605_v30, 1  ;;  %v808_v41 = vld [vmem:[#allocation3 + $0x2] ss:$4 sm:$0x3]  ;;  %vm501_vm5 = vcmp.eq.s32.totalorder %v1909_v18, %v1975_v36  ;;  %vm533_vm6 = vcmp.eq.s32.totalorder %v1912_v21, %v1975_v36 }
  0x51   : > { %v1993_v42 = vperm.slane %v808_v41, 0  ;;  %v1995_v43 = vperm.slane %v808_v41, 1  ;;  %v1011_v44 = vld [vmem:[#allocation3 + $0x3] ss:$4 sm:$0x3]  ;;  %vm499_vm7 = vcmp.eq.s32.totalorder %v1915_v24, %v1975_v36  ;;  %vm531_vm8 = vcmp.eq.s32.totalorder %v1918_v25, %v1975_v36 }
  0x52   : > { %v534_v17 = vld [vmem:[#allocation4] ss:$4 sm:$0x3]  ;;  %v2001_v45 = vperm.slane %v1011_v44, 0  ;;  %v2003_v46 = vperm.slane %v1011_v44, 1  ;;  %vm639_vm9 = vcmp.eq.s32.totalorder %v1909_v18, %v1987_v40  ;;  %vm671_vm10 = vcmp.eq.s32.totalorder %v1912_v21, %v1987_v40 }
  0x53   : > { %v2009_v47 = vperm.slane %v534_v17, 0  ;;  %v2011_v48 = vperm.slane %v534_v17, 1  ;;  %vm842_vm11 = vcmp.eq.s32.totalorder %v1909_v18, %v1995_v43  ;;  %vm874_vm12 = vcmp.eq.s32.totalorder %v1912_v21, %v1995_v43 }
  0x54   : > { %v673_v49 = vld [vmem:[#allocation4 + $0x1] ss:$4 sm:$0x3]  ;;  %vm1045_vm13 = vcmp.eq.s32.totalorder %v1909_v18, %v2003_v46  ;;  %vm1077_vm14 = vcmp.eq.s32.totalorder %v1912_v21, %v2003_v46  ;;  %vm637_vm15 = vcmp.eq.s32.totalorder %v1915_v24, %v1987_v40  ;;  %vm840_vm0 = vcmp.eq.s32.totalorder %v1915_v24, %v1995_v43 }
  0x55   : > { %v2025_v50 = vperm.slane %v673_v49, 0  ;;  %v2027_v51 = vperm.slane %v673_v49, 1  ;;  %v876_v52 = vld [vmem:[#allocation4 + $0x2] ss:$4 sm:$0x3]  ;;  %v571_v53 = vsel %vm501_vm5, %v2011_v48, 0.0  ;;  %vm1043_vm1 = vcmp.eq.s32.totalorder %v1915_v24, %v2003_v46 }
  0x56   : > { %v2035_v54 = vperm.slane %v876_v52, 0  ;;  %v2037_v55 = vperm.slane %v876_v52, 1  ;;  %v1079_v56 = vld [vmem:[#allocation4 + $0x3] ss:$4 sm:$0x3]  ;;  %v603_v57 = vsel %vm533_vm6, %v2011_v48, 0.0  ;;  %vm669_vm2 = vcmp.eq.s32.totalorder %v1918_v25, %v1987_v40 }
  0x57   : > { %v2045_v58 = vperm.slane %v1079_v56, 0  ;;  %v2047_v59 = vperm.slane %v1079_v56, 1  ;;  %v710_v60 = vsel %vm639_vm9, %v2027_v51, 0.0  ;;  %v742_v61 = vsel %vm671_vm10, %v2027_v51, 0.0 }
  0x58   : > { %v774_v62 = vadd.f32 %v710_v60, %v571_v53  ;;  %v913_v63 = vsel %vm842_vm11, %v2037_v55, 0.0  ;;  %v806_v0 = vadd.f32 %v742_v61, %v603_v57  ;;  %v945_v1 = vsel %vm874_vm12, %v2037_v55, 0.0 }
  0x59   : > { %v1116_v2 = vsel %vm1045_vm13, %v2047_v59, 0.0  ;;  %v1148_v3 = vsel %vm1077_vm14, %v2047_v59, 0.0  ;;  %v569_v4 = vsel %vm499_vm7, %v2011_v48, 0.0  ;;  %v708_v5 = vsel %vm637_vm15, %v2027_v51, 0.0 }
  0x5a   : > { %v977_v6 = vadd.f32 %v913_v63, %v774_v62  ;;  %v1009_v7 = vadd.f32 %v945_v1, %v806_v0  ;;  %v772_v8 = vadd.f32 %v708_v5, %v569_v4  ;;  %v911_v10 = vsel %vm840_vm0, %v2037_v55, 0.0 }
  0x5b   : > { %v1114_v11 = vsel %vm1043_vm1, %v2047_v59, 0.0  ;;  %v601_v12 = vsel %vm531_vm8, %v2011_v48, 0.0  ;;  %v740_v13 = vsel %vm669_vm2, %v2027_v51, 0.0  ;;  %vm872_vm3 = vcmp.eq.s32.totalorder %v1918_v25, %v1995_v43 }
  0x5c   : > { %v1180_v14 = vadd.f32 %v1116_v2, %v977_v6  ;;  %v1212_v15 = vadd.f32 %v1148_v3, %v1009_v7  ;;  %v975_v16 = vadd.f32 %v911_v10, %v772_v8  ;;  %v804_v19 = vadd.f32 %v740_v13, %v601_v12 }
  0x5d   : > { %v943_v20 = vsel %vm872_vm3, %v2037_v55, 0.0  ;;  %vm1075_vm4 = vcmp.eq.s32.totalorder %v1918_v25, %v2003_v46  ;;  %vm497_vm5 = vcmp.eq.s32.totalorder %v1921_v29, %v1975_v36  ;;  %vm635_vm6 = vcmp.eq.s32.totalorder %v1921_v29, %v1987_v40 }
  0x5e   : > { %vm500_vm7 = vcmp.eq.s32.totalorder %v1909_v18, %v1970_v34  ;;  %1261 = vmatpush.msra.mxu2 %v1180_v14  ;;  %1281 = vmatpush.msra.mxu3 %v1212_v15  ;;  %v1178_v22 = vadd.f32 %v1114_v11, %v975_v16  ;;  %v1007_v23 = vadd.f32 %v943_v20, %v804_v19  ;;  %v1146_v26 = vsel %vm1075_vm4, %v2047_v59, 0.0 }
  0x5f   : > { %v567_v28 = vsel %vm497_vm5, %v2011_v48, 0.0  ;;  %v706_v31 = vsel %vm635_vm6, %v2027_v51, 0.0  ;;  %vm838_vm8 = vcmp.eq.s32.totalorder %v1921_v29, %v1995_v43  ;;  %vm1041_vm9 = vcmp.eq.s32.totalorder %v1921_v29, %v2003_v46 }
  0x60   : > { %vm529_vm10 = vcmp.eq.s32.totalorder %v1926_v33, %v1975_v36  ;;  %1262 = vmatpush.msra.mxu2 %v1178_v22  ;;  %v1210_v32 = vadd.f32 %v1146_v26, %v1007_v23  ;;  %v770_v35 = vadd.f32 %v706_v31, %v567_v28  ;;  %v909_v30 = vsel %vm838_vm8, %v2037_v55, 0.0 }
  0x61   : > { %v1112_v41 = vsel %vm1041_vm9, %v2047_v59, 0.0  ;;  %vm532_vm11 = vcmp.eq.s32.totalorder %v1912_v21, %v1970_v34  ;;  %v599_v44 = vsel %vm529_vm10, %v2011_v48, 0.0  ;;  %vm667_vm12 = vcmp.eq.s32.totalorder %v1926_v33, %v1987_v40 }
  0x62   : > { %vm870_vm13 = vcmp.eq.s32.totalorder %v1926_v33, %v1995_v43  ;;  %vm1073_vm14 = vcmp.eq.s32.totalorder %v1926_v33, %v2003_v46  ;;  %1282 = vmatpush.msra.mxu3 %v1210_v32  ;;  %v973_v17 = vadd.f32 %v909_v30, %v770_v35  ;;  %v738_v49 = vsel %vm667_vm12, %v2027_v51, 0.0 }
  0x63   : > { %v941_v52 = vsel %vm870_vm13, %v2037_v55, 0.0  ;;  %v1144_v53 = vsel %vm1073_vm14, %v2047_v59, 0.0  ;;  %v802_v56 = vadd.f32 %v738_v49, %v599_v44  ;;  %vm495_vm15 = vcmp.eq.s32.totalorder %v1962_v27, %v1975_v36 }
  0x64   : > { %vm633_vm0 = vcmp.eq.s32.totalorder %v1962_v27, %v1987_v40  ;;  %vm836_vm1 = vcmp.eq.s32.totalorder %v1962_v27, %v1995_v43  ;;  %v1176_v57 = vadd.f32 %v1112_v41, %v973_v17  ;;  %v565_v60 = vsel %vm495_vm15, %v2011_v48, 0.0 }
  0x65   : > { %v704_v61 = vsel %vm633_vm0, %v2027_v51, 0.0  ;;  %v907_v62 = vsel %vm836_vm1, %v2037_v55, 0.0  ;;  %v1005_v63 = vadd.f32 %v941_v52, %v802_v56  ;;  %vm1039_vm2 = vcmp.eq.s32.totalorder %v1962_v27, %v2003_v46 }
  0x66   : > { %v768_v0 = vadd.f32 %v704_v61, %v565_v60  ;;  %vm527_vm3 = vcmp.eq.s32.totalorder %v1978_v37, %v1975_v36  ;;  %1263 = vmatpush.msra.mxu2 %v1176_v57  ;;  %v1110_v1 = vsel %vm1039_vm2, %v2047_v59, 0.0  ;;  %vm665_vm4 = vcmp.eq.s32.totalorder %v1978_v37, %v1987_v40 }
  0x67   : > { %v597_v2 = vsel %vm527_vm3, %v2011_v48, 0.0  ;;  %vm868_vm5 = vcmp.eq.s32.totalorder %v1978_v37, %v1995_v43  ;;  %v1208_v3 = vadd.f32 %v1144_v53, %v1005_v63  ;;  %v736_v5 = vsel %vm665_vm4, %v2027_v51, 0.0 }
  0x68   : > { %v971_v4 = vadd.f32 %v907_v62, %v768_v0  ;;  %v939_v6 = vsel %vm868_vm5, %v2037_v55, 0.0  ;;  %v800_v7 = vadd.f32 %v736_v5, %v597_v2  ;;  %vm1071_vm6 = vcmp.eq.s32.totalorder %v1978_v37, %v2003_v46 }
  0x69   : > { %v570_v8 = vsel %vm500_vm7, %v2009_v47, 0.0  ;;  %vm638_vm8 = vcmp.eq.s32.totalorder %v1909_v18, %v1985_v39  ;;  %1283 = vmatpush.msra.mxu3 %v1208_v3  ;;  %v1142_v11 = vsel %vm1071_vm6, %v2047_v59, 0.0  ;;  %vm841_vm9 = vcmp.eq.s32.totalorder %v1909_v18, %v1993_v42 }
  0x6a   : > { %v1174_v10 = vadd.f32 %v1110_v1, %v971_v4  ;;  %v709_v12 = vsel %vm638_vm8, %v2025_v50, 0.0  ;;  %v1003_v13 = vadd.f32 %v939_v6, %v800_v7  ;;  %v912_v15 = vsel %vm841_vm9, %v2035_v54, 0.0 }
  0x6b   : > { %v773_v14 = vadd.f32 %v709_v12, %v570_v8  ;;  %vm1044_vm10 = vcmp.eq.s32.totalorder %v1909_v18, %v2001_v45  ;;  %v602_v19 = vsel %vm532_vm11, %v2009_v47, 0.0  ;;  %vm670_vm7 = vcmp.eq.s32.totalorder %v1912_v21, %v1985_v39 }
  0x6c   : > { %1264 = vmatpush.msra.mxu2 %v1174_v10  ;;  %v1115_v16 = vsel %vm1044_vm10, %v2045_v58, 0.0  ;;  %vm873_vm12 = vcmp.eq.s32.totalorder %v1912_v21, %v1993_v42  ;;  %v1206_v20 = vadd.f32 %v1142_v11, %v1003_v13  ;;  %v741_v23 = vsel %vm670_vm7, %v2025_v50, 0.0 }
  0x6d   : > { %v976_v22 = vadd.f32 %v912_v15, %v773_v14  ;;  %v944_v18 = vsel %vm873_vm12, %v2035_v54, 0.0  ;;  %v805_v26 = vadd.f32 %v741_v23, %v602_v19  ;;  %vm1076_vm13 = vcmp.eq.s32.totalorder %v1912_v21, %v2001_v45 }
  0x6e   : > { %vm493_vm14 = vcmp.eq.s32.totalorder %v1981_v38, %v1975_v36  ;;  %vm631_vm11 = vcmp.eq.s32.totalorder %v1981_v38, %v1987_v40  ;;  %1284 = vmatpush.msra.mxu3 %v1206_v20  ;;  %v1147_v31 = vsel %vm1076_vm13, %v2045_v58, 0.0  ;;  %vm834_vm15 = vcmp.eq.s32.totalorder %v1981_v38, %v1995_v43 }
  0x6f   : > { %v1179_v28 = vadd.f32 %v1115_v16, %v976_v22  ;;  %v563_v32 = vsel %vm493_vm14, %v2011_v48, 0.0  ;;  %v702_v35 = vsel %vm631_vm11, %v2027_v51, 0.0  ;;  %v1008_v30 = vadd.f32 %v944_v18, %v805_v26 }
  0x70   : > { %v766_v41 = vadd.f32 %v702_v35, %v563_v32  ;;  %vm1037_vm0 = vcmp.eq.s32.totalorder %v1981_v38, %v2003_v46  ;;  %v905_v21 = vsel %vm834_vm15, %v2037_v55, 0.0  ;;  %v2194_v17 = vadd.s32 216, %v1902_v9 }
  0x71   : > { %1221 = vmatpush.msra.mxu0 %v1179_v28  ;;  %v1108_v44 = vsel %vm1037_vm0, %v2047_v59, 0.0  ;;  %vm498_vm1 = vcmp.eq.s32.totalorder %v1915_v24, %v1970_v34  ;;  %v1211_v49 = vadd.f32 %v1147_v31, %v1008_v30  ;;  %vm636_vm2 = vcmp.eq.s32.totalorder %v1915_v24, %v1985_v39 }
  0x72   : > { %v969_v52 = vadd.f32 %v905_v21, %v766_v41  ;;  %v568_v53 = vsel %vm498_vm1, %v2009_v47, 0.0  ;;  %vm525_vm3 = vcmp.eq.s32.totalorder %v2194_v17, %v1975_v36  ;;  %vm663_vm4 = vcmp.eq.s32.totalorder %v2194_v17, %v1987_v40 }
  0x73   : > { %vm866_vm5 = vcmp.eq.s32.totalorder %v2194_v17, %v1995_v43  ;;  %vm1069_vm6 = vcmp.eq.s32.totalorder %v2194_v17, %v2003_v46  ;;  %1241 = vmatpush.msra.mxu1 %v1211_v49  ;;  %v595_v57 = vsel %vm525_vm3, %v2011_v48, 0.0  ;;  %v734_v60 = vsel %vm663_vm4, %v2027_v51, 0.0 }
  0x74   : > { %v1172_v56 = vadd.f32 %v1108_v44, %v969_v52  ;;  %v937_v61 = vsel %vm866_vm5, %v2037_v55, 0.0  ;;  %v798_v62 = vadd.f32 %v734_v60, %v595_v57  ;;  %v1140_v63 = vsel %vm1069_vm6, %v2047_v59, 0.0 }
  0x75   : > { %v707_v0 = vsel %vm636_vm2, %v2025_v50, 0.0  ;;  %vm839_vm8 = vcmp.eq.s32.totalorder %v1915_v24, %v1993_v42  ;;  %vm1042_vm9 = vcmp.eq.s32.totalorder %v1915_v24, %v2001_v45  ;;  %vm530_vm10 = vcmp.eq.s32.totalorder %v1918_v25, %v1970_v34 }
  0x76   : > { %1265 = vmatpush.msra.mxu2 %v1172_v56  ;;  %v771_v1 = vadd.f32 %v707_v0, %v568_v53  ;;  %v910_v2 = vsel %vm839_vm8, %v2035_v54, 0.0  ;;  %v1001_v3 = vadd.f32 %v937_v61, %v798_v62  ;;  %v1113_v4 = vsel %vm1042_vm9, %v2045_v58, 0.0 }
  0x77   : > { %v600_v5 = vsel %vm530_vm10, %v2009_v47, 0.0  ;;  %vm668_vm7 = vcmp.eq.s32.totalorder %v1918_v25, %v1985_v39  ;;  %vm871_vm12 = vcmp.eq.s32.totalorder %v1918_v25, %v1993_v42  ;;  %vm1074_vm13 = vcmp.eq.s32.totalorder %v1918_v25, %v2001_v45 }
  0x78   : > { %v974_v6 = vadd.f32 %v910_v2, %v771_v1  ;;  %v739_v7 = vsel %vm668_vm7, %v2025_v50, 0.0  ;;  %v1204_v24 = vadd.f32 %v1140_v63, %v1001_v3  ;;  %v942_v10 = vsel %vm871_vm12, %v2035_v54, 0.0 }
  0x79   : > { %v803_v8 = vadd.f32 %v739_v7, %v600_v5  ;;  %v1145_v11 = vsel %vm1074_vm13, %v2045_v58, 0.0  ;;  %v2233_v13 = vadd.s32 80, %v1902_v9  ;;  %v2236_v14 = vadd.s32 208, %v1902_v9 }
  0x7a   : > { %v1177_v12 = vadd.f32 %v1113_v4, %v974_v6  ;;  %vm496_vm14 = vcmp.eq.s32.totalorder %v1921_v29, %v1970_v34  ;;  %1285 = vmatpush.msra.mxu3 %v1204_v24  ;;  %vm634_vm11 = vcmp.eq.s32.totalorder %v1921_v29, %v1985_v39  ;;  %vm837_vm15 = vcmp.eq.s32.totalorder %v1921_v29, %v1993_v42 }
  0x7b   : > { %v1006_v15 = vadd.f32 %v942_v10, %v803_v8  ;;  %v566_v25 = vsel %vm496_vm14, %v2009_v47, 0.0  ;;  %vm491_vm0 = vcmp.eq.s32.totalorder %v2233_v13, %v1975_v36  ;;  %vm629_vm1 = vcmp.eq.s32.totalorder %v2233_v13, %v1987_v40 }
  0x7c   : > { %1222 = vmatpush.msra.mxu0 %v1177_v12  ;;  %vm832_vm2 = vcmp.eq.s32.totalorder %v2233_v13, %v1995_v43  ;;  %vm1035_vm3 = vcmp.eq.s32.totalorder %v2233_v13, %v2003_v46  ;;  %v561_v19 = vsel %vm491_vm0, %v2011_v48, 0.0  ;;  %v700_v20 = vsel %vm629_vm1, %v2027_v51, 0.0 }
  0x7d   : > { %v1209_v16 = vadd.f32 %v1145_v11, %v1006_v15  ;;  %v903_v22 = vsel %vm832_vm2, %v2037_v55, 0.0  ;;  %v764_v23 = vadd.f32 %v700_v20, %v561_v19  ;;  %v1106_v18 = vsel %vm1035_vm3, %v2047_v59, 0.0 }
  0x7e   : > { %vm523_vm4 = vcmp.eq.s32.totalorder %v2236_v14, %v1975_v36  ;;  %vm661_vm5 = vcmp.eq.s32.totalorder %v2236_v14, %v1987_v40  ;;  %vm864_vm6 = vcmp.eq.s32.totalorder %v2236_v14, %v1995_v43  ;;  %vm1067_vm8 = vcmp.eq.s32.totalorder %v2236_v14, %v2003_v46 }
  0x7f   : > { %1242 = vmatpush.msra.mxu1 %v1209_v16  ;;  %v593_v26 = vsel %vm523_vm4, %v2011_v48, 0.0  ;;  %v732_v28 = vsel %vm661_vm5, %v2027_v51, 0.0  ;;  %v967_v31 = vadd.f32 %v903_v22, %v764_v23  ;;  %v935_v35 = vsel %vm864_vm6, %v2037_v55, 0.0 }
  0x80   : > { %v796_v32 = vadd.f32 %v732_v28, %v593_v26  ;;  %v1138_v30 = vsel %vm1067_vm8, %v2047_v59, 0.0  ;;  %v705_v41 = vsel %vm634_vm11, %v2025_v50, 0.0  ;;  %v908_v21 = vsel %vm837_vm15, %v2035_v54, 0.0 }
  0x81   : > { %vm1040_vm9 = vcmp.eq.s32.totalorder %v1921_v29, %v2001_v45  ;;  %vm528_vm10 = vcmp.eq.s32.totalorder %v1926_v33, %v1970_v34  ;;  %v1170_v44 = vadd.f32 %v1106_v18, %v967_v31  ;;  %v769_v52 = vadd.f32 %v705_v41, %v566_v25 }
  0x82   : > { %v999_v49 = vadd.f32 %v935_v35, %v796_v32  ;;  %v1111_v53 = vsel %vm1040_vm9, %v2045_v58, 0.0  ;;  %v598_v56 = vsel %vm528_vm10, %v2009_v47, 0.0  ;;  %vm666_vm7 = vcmp.eq.s32.totalorder %v1926_v33, %v1985_v39 }
  0x83   : > { %vm869_vm12 = vcmp.eq.s32.totalorder %v1926_v33, %v1993_v42  ;;  %vm1072_vm13 = vcmp.eq.s32.totalorder %v1926_v33, %v2001_v45  ;;  %1266 = vmatpush.msra.mxu2 %v1170_v44  ;;  %v972_v57 = vadd.f32 %v908_v21, %v769_v52  ;;  %v737_v60 = vsel %vm666_vm7, %v2025_v50, 0.0 }
  0x84   : > { %v1202_v29 = vadd.f32 %v1138_v30, %v999_v49  ;;  %v940_v61 = vsel %vm869_vm12, %v2035_v54, 0.0  ;;  %v801_v62 = vadd.f32 %v737_v60, %v598_v56  ;;  %v1143_v63 = vsel %vm1072_vm13, %v2045_v58, 0.0 }
  0x85   : > { %v2293_v0 = vadd.s32 72, %v1902_v9  ;;  %v2296_v1 = vadd.s32 200, %v1902_v9  ;;  %v1175_v2 = vadd.f32 %v1111_v53, %v972_v57  ;;  %vm494_vm14 = vcmp.eq.s32.totalorder %v1962_v27, %v1970_v34 }
  0x86   : > { %1286 = vmatpush.msra.mxu3 %v1202_v29  ;;  %vm632_vm11 = vcmp.eq.s32.totalorder %v1962_v27, %v1985_v39  ;;  %vm835_vm15 = vcmp.eq.s32.totalorder %v1962_v27, %v1993_v42  ;;  %v1004_v33 = vadd.f32 %v940_v61, %v801_v62  ;;  %v564_v16 = vsel %vm494_vm14, %v2009_v47, 0.0 }
  0x87   : > { %vm489_vm0 = vcmp.eq.s32.totalorder %v2293_v0, %v1975_v36  ;;  %vm627_vm1 = vcmp.eq.s32.totalorder %v2293_v0, %v1987_v40  ;;  %vm830_vm2 = vcmp.eq.s32.totalorder %v2293_v0, %v1995_v43  ;;  %1223 = vmatpush.msra.mxu0 %v1175_v2  ;;  %vm1033_vm3 = vcmp.eq.s32.totalorder %v2293_v0, %v2003_v46 }
  0x88   : > { %v559_v3 = vsel %vm489_vm0, %v2011_v48, 0.0  ;;  %v698_v4 = vsel %vm627_vm1, %v2027_v51, 0.0  ;;  %v901_v5 = vsel %vm830_vm2, %v2037_v55, 0.0  ;;  %v1207_v6 = vadd.f32 %v1143_v63, %v1004_v33 }
  0x89   : > { %v762_v7 = vadd.f32 %v698_v4, %v559_v3  ;;  %v1104_v24 = vsel %vm1033_vm3, %v2047_v59, 0.0  ;;  %vm521_vm4 = vcmp.eq.s32.totalorder %v2296_v1, %v1975_v36  ;;  %vm659_vm5 = vcmp.eq.s32.totalorder %v2296_v1, %v1987_v40 }
  0x8a   : > { %v591_v8 = vsel %vm521_vm4, %v2011_v48, 0.0  ;;  %vm862_vm6 = vcmp.eq.s32.totalorder %v2296_v1, %v1995_v43  ;;  %vm1065_vm8 = vcmp.eq.s32.totalorder %v2296_v1, %v2003_v46  ;;  %1243 = vmatpush.msra.mxu1 %v1207_v6  ;;  %v730_v11 = vsel %vm659_vm5, %v2027_v51, 0.0 }
  0x8b   : > { %v965_v10 = vadd.f32 %v901_v5, %v762_v7  ;;  %v933_v12 = vsel %vm862_vm6, %v2037_v55, 0.0  ;;  %v1136_v15 = vsel %vm1065_vm8, %v2047_v59, 0.0  ;;  %v794_v25 = vadd.f32 %v730_v11, %v591_v8 }
  0x8c   : > { %v703_v19 = vsel %vm632_vm11, %v2025_v50, 0.0  ;;  %v906_v20 = vsel %vm835_vm15, %v2035_v54, 0.0  ;;  %vm1038_vm9 = vcmp.eq.s32.totalorder %v1962_v27, %v2001_v45  ;;  %vm526_vm10 = vcmp.eq.s32.totalorder %v1978_v37, %v1970_v34 }
  0x8d   : > { %v1168_v22 = vadd.f32 %v1104_v24, %v965_v10  ;;  %v767_v23 = vadd.f32 %v703_v19, %v564_v16  ;;  %v997_v18 = vadd.f32 %v933_v12, %v794_v25  ;;  %v1109_v26 = vsel %vm1038_vm9, %v2045_v58, 0.0 }
  0x8e   : > { %v596_v28 = vsel %vm526_vm10, %v2009_v47, 0.0  ;;  %vm664_vm7 = vcmp.eq.s32.totalorder %v1978_v37, %v1985_v39  ;;  %vm867_vm12 = vcmp.eq.s32.totalorder %v1978_v37, %v1993_v42  ;;  %vm1070_vm13 = vcmp.eq.s32.totalorder %v1978_v37, %v2001_v45 }
  0x8f   : > { %1267 = vmatpush.msra.mxu2 %v1168_v22  ;;  %v970_v31 = vadd.f32 %v906_v20, %v767_v23  ;;  %v735_v32 = vsel %vm664_vm7, %v2025_v50, 0.0  ;;  %v1200_v27 = vadd.f32 %v1136_v15, %v997_v18  ;;  %v938_v30 = vsel %vm867_vm12, %v2035_v54, 0.0 }
  0x90   : > { %v799_v35 = vadd.f32 %v735_v32, %v596_v28  ;;  %v1141_v41 = vsel %vm1070_vm13, %v2045_v58, 0.0  ;;  %v2356_v44 = vadd.s32 64, %v1902_v9  ;;  %v2359_v49 = vadd.s32 192, %v1902_v9 }
  0x91   : > { %v1173_v21 = vadd.f32 %v1109_v26, %v970_v31  ;;  %vm492_vm14 = vcmp.eq.s32.totalorder %v1981_v38, %v1970_v34  ;;  %1287 = vmatpush.msra.mxu3 %v1200_v27  ;;  %vm630_vm11 = vcmp.eq.s32.totalorder %v1981_v38, %v1985_v39  ;;  %vm833_vm15 = vcmp.eq.s32.totalorder %v1981_v38, %v1993_v42 }
  0x92   : > { %v1002_v52 = vadd.f32 %v938_v30, %v799_v35  ;;  %v562_v37 = vsel %vm492_vm14, %v2009_v47, 0.0  ;;  %vm487_vm0 = vcmp.eq.s32.totalorder %v2356_v44, %v1975_v36  ;;  %vm625_vm1 = vcmp.eq.s32.totalorder %v2356_v44, %v1987_v40 }
  0x93   : > { %1224 = vmatpush.msra.mxu0 %v1173_v21  ;;  %vm828_vm2 = vcmp.eq.s32.totalorder %v2356_v44, %v1995_v43  ;;  %vm1031_vm3 = vcmp.eq.s32.totalorder %v2356_v44, %v2003_v46  ;;  %v557_v56 = vsel %vm487_vm0, %v2011_v48, 0.0  ;;  %v696_v29 = vsel %vm625_vm1, %v2027_v51, 0.0 }
  0x94   : > { %v1205_v53 = vadd.f32 %v1141_v41, %v1002_v52  ;;  %v899_v57 = vsel %vm828_vm2, %v2037_v55, 0.0  ;;  %v760_v60 = vadd.f32 %v696_v29, %v557_v56  ;;  %v1102_v61 = vsel %vm1031_vm3, %v2047_v59, 0.0 }
  0x95   : > { %vm519_vm4 = vcmp.eq.s32.totalorder %v2359_v49, %v1975_v36  ;;  %vm657_vm5 = vcmp.eq.s32.totalorder %v2359_v49, %v1987_v40  ;;  %vm860_vm6 = vcmp.eq.s32.totalorder %v2359_v49, %v1995_v43  ;;  %vm1063_vm8 = vcmp.eq.s32.totalorder %v2359_v49, %v2003_v46 }
  0x96   : > { %1244 = vmatpush.msra.mxu1 %v1205_v53  ;;  %v589_v62 = vsel %vm519_vm4, %v2011_v48, 0.0  ;;  %v728_v63 = vsel %vm657_vm5, %v2027_v51, 0.0  ;;  %v963_v2 = vadd.f32 %v899_v57, %v760_v60  ;;  %v931_v3 = vsel %vm860_vm6, %v2037_v55, 0.0 }
  0x97   : > { %v792_v33 = vadd.f32 %v728_v63, %v589_v62  ;;  %v1134_v4 = vsel %vm1063_vm8, %v2047_v59, 0.0  ;;  %v701_v5 = vsel %vm630_vm11, %v2025_v50, 0.0  ;;  %v904_v6 = vsel %vm833_vm15, %v2035_v54, 0.0 }
  0x98   : > { %vm1036_vm9 = vcmp.eq.s32.totalorder %v1981_v38, %v2001_v45  ;;  %vm524_vm10 = vcmp.eq.s32.totalorder %v2194_v17, %v1970_v34  ;;  %v1166_v7 = vadd.f32 %v1102_v61, %v963_v2  ;;  %v765_v8 = vadd.f32 %v701_v5, %v562_v37 }
  0x99   : > { %v995_v24 = vadd.f32 %v931_v3, %v792_v33  ;;  %v1107_v10 = vsel %vm1036_vm9, %v2045_v58, 0.0  ;;  %v594_v11 = vsel %vm524_vm10, %v2009_v47, 0.0  ;;  %vm662_vm7 = vcmp.eq.s32.totalorder %v2194_v17, %v1985_v39 }
  0x9a   : > { %vm865_vm12 = vcmp.eq.s32.totalorder %v2194_v17, %v1993_v42  ;;  %vm1068_vm13 = vcmp.eq.s32.totalorder %v2194_v17, %v2001_v45  ;;  %1268 = vmatpush.msra.mxu2 %v1166_v7  ;;  %v968_v12 = vadd.f32 %v904_v6, %v765_v8  ;;  %v733_v15 = vsel %vm662_vm7, %v2025_v50, 0.0 }
  0x9b   : > { %v1198_v38 = vadd.f32 %v1134_v4, %v995_v24  ;;  %v936_v25 = vsel %vm865_vm12, %v2035_v54, 0.0  ;;  %v797_v16 = vadd.f32 %v733_v15, %v594_v11  ;;  %v1139_v19 = vsel %vm1068_vm13, %v2045_v58, 0.0 }
  0x9c   : > { %v2416_v20 = vadd.s32 56, %v1902_v9  ;;  %v2419_v22 = vadd.s32 184, %v1902_v9  ;;  %v1171_v23 = vadd.f32 %v1107_v10, %v968_v12  ;;  %vm490_vm14 = vcmp.eq.s32.totalorder %v2233_v13, %v1970_v34 }
  0x9d   : > { %1288 = vmatpush.msra.mxu3 %v1198_v38  ;;  %vm628_vm11 = vcmp.eq.s32.totalorder %v2233_v13, %v1985_v39  ;;  %vm831_vm15 = vcmp.eq.s32.totalorder %v2233_v13, %v1993_v42  ;;  %v1000_v17 = vadd.f32 %v936_v25, %v797_v16  ;;  %v560_v53 = vsel %vm490_vm14, %v2009_v47, 0.0 }
  0x9e   : > { %vm485_vm0 = vcmp.eq.s32.totalorder %v2416_v20, %v1975_v36  ;;  %vm623_vm1 = vcmp.eq.s32.totalorder %v2416_v20, %v1987_v40  ;;  %vm826_vm2 = vcmp.eq.s32.totalorder %v2416_v20, %v1995_v43  ;;  %1225 = vmatpush.msra.mxu0 %v1171_v23  ;;  %vm1029_vm3 = vcmp.eq.s32.totalorder %v2416_v20, %v2003_v46 }
  0x9f   : > { %v555_v18 = vsel %vm485_vm0, %v2011_v48, 0.0  ;;  %v694_v26 = vsel %vm623_vm1, %v2027_v51, 0.0  ;;  %v897_v28 = vsel %vm826_vm2, %v2037_v55, 0.0  ;;  %v1203_v31 = vadd.f32 %v1139_v19, %v1000_v17 }
  0xa0   : > { %v758_v32 = vadd.f32 %v694_v26, %v555_v18  ;;  %v1100_v27 = vsel %vm1029_vm3, %v2047_v59, 0.0  ;;  %vm517_vm4 = vcmp.eq.s32.totalorder %v2419_v22, %v1975_v36  ;;  %vm655_vm5 = vcmp.eq.s32.totalorder %v2419_v22, %v1987_v40 }
  0xa1   : > { %v587_v35 = vsel %vm517_vm4, %v2011_v48, 0.0  ;;  %vm858_vm6 = vcmp.eq.s32.totalorder %v2419_v22, %v1995_v43  ;;  %vm1061_vm8 = vcmp.eq.s32.totalorder %v2419_v22, %v2003_v46  ;;  %1245 = vmatpush.msra.mxu1 %v1203_v31  ;;  %v726_v41 = vsel %vm655_vm5, %v2027_v51, 0.0 }
  0xa2   : > { %v961_v30 = vadd.f32 %v897_v28, %v758_v32  ;;  %v929_v21 = vsel %vm858_vm6, %v2037_v55, 0.0  ;;  %v1132_v52 = vsel %vm1061_vm8, %v2047_v59, 0.0  ;;  %v790_v37 = vadd.f32 %v726_v41, %v587_v35 }
  0xa3   : > { %v699_v56 = vsel %vm628_vm11, %v2025_v50, 0.0  ;;  %v902_v29 = vsel %vm831_vm15, %v2035_v54, 0.0  ;;  %vm1034_vm9 = vcmp.eq.s32.totalorder %v2233_v13, %v2001_v45  ;;  %vm522_vm10 = vcmp.eq.s32.totalorder %v2236_v14, %v1970_v34 }
  0xa4   : > { %v1164_v57 = vadd.f32 %v1100_v27, %v961_v30  ;;  %v763_v60 = vadd.f32 %v699_v56, %v560_v53  ;;  %v993_v61 = vadd.f32 %v929_v21, %v790_v37  ;;  %v1105_v62 = vsel %vm1034_vm9, %v2045_v58, 0.0 }
  0xa5   : > { %v592_v63 = vsel %vm522_vm10, %v2009_v47, 0.0  ;;  %vm660_vm7 = vcmp.eq.s32.totalorder %v2236_v14, %v1985_v39  ;;  %vm863_vm12 = vcmp.eq.s32.totalorder %v2236_v14, %v1993_v42  ;;  %vm1066_vm13 = vcmp.eq.s32.totalorder %v2236_v14, %v2001_v45 }
  0xa6   : > { %1269 = vmatpush.msra.mxu2 %v1164_v57  ;;  %v966_v2 = vadd.f32 %v902_v29, %v763_v60  ;;  %v731_v33 = vsel %vm660_vm7, %v2025_v50, 0.0  ;;  %v1196_v13 = vadd.f32 %v1132_v52, %v993_v61  ;;  %v934_v4 = vsel %vm863_vm12, %v2035_v54, 0.0 }
  0xa7   : > { %v795_v3 = vadd.f32 %v731_v33, %v592_v63  ;;  %v1137_v5 = vsel %vm1066_vm13, %v2045_v58, 0.0  ;;  %v2479_v7 = vadd.s32 48, %v1902_v9  ;;  %v2482_v24 = vadd.s32 176, %v1902_v9 }
  0xa8   : > { %v1169_v6 = vadd.f32 %v1105_v62, %v966_v2  ;;  %vm488_vm14 = vcmp.eq.s32.totalorder %v2293_v0, %v1970_v34  ;;  %1289 = vmatpush.msra.mxu3 %v1196_v13  ;;  %vm626_vm11 = vcmp.eq.s32.totalorder %v2293_v0, %v1985_v39  ;;  %vm829_vm15 = vcmp.eq.s32.totalorder %v2293_v0, %v1993_v42 }
  0xa9   : > { %v998_v8 = vadd.f32 %v934_v4, %v795_v3  ;;  %v558_v14 = vsel %vm488_vm14, %v2009_v47, 0.0  ;;  %vm483_vm0 = vcmp.eq.s32.totalorder %v2479_v7, %v1975_v36  ;;  %vm621_vm1 = vcmp.eq.s32.totalorder %v2479_v7, %v1987_v40 }
  0xaa   : > { %1226 = vmatpush.msra.mxu0 %v1169_v6  ;;  %vm824_vm2 = vcmp.eq.s32.totalorder %v2479_v7, %v1995_v43  ;;  %vm1027_vm3 = vcmp.eq.s32.totalorder %v2479_v7, %v2003_v46  ;;  %v553_v11 = vsel %vm483_vm0, %v2011_v48, 0.0  ;;  %v692_v38 = vsel %vm621_vm1, %v2027_v51, 0.0 }
  0xab   : > { %v1201_v10 = vadd.f32 %v1137_v5, %v998_v8  ;;  %v895_v12 = vsel %vm824_vm2, %v2037_v55, 0.0  ;;  %v756_v15 = vadd.f32 %v692_v38, %v553_v11  ;;  %v1098_v25 = vsel %vm1027_vm3, %v2047_v59, 0.0 }
  0xac   : > { %vm515_vm4 = vcmp.eq.s32.totalorder %v2482_v24, %v1975_v36  ;;  %vm653_vm5 = vcmp.eq.s32.totalorder %v2482_v24, %v1987_v40  ;;  %vm856_vm6 = vcmp.eq.s32.totalorder %v2482_v24, %v1995_v43  ;;  %vm1059_vm8 = vcmp.eq.s32.totalorder %v2482_v24, %v2003_v46 }
  0xad   : > { %1246 = vmatpush.msra.mxu1 %v1201_v10  ;;  %v585_v16 = vsel %vm515_vm4, %v2011_v48, 0.0  ;;  %v724_v19 = vsel %vm653_vm5, %v2027_v51, 0.0  ;;  %v959_v23 = vadd.f32 %v895_v12, %v756_v15  ;;  %v927_v18 = vsel %vm856_vm6, %v2037_v55, 0.0 }
  0xae   : > { %v788_v17 = vadd.f32 %v724_v19, %v585_v16  ;;  %v1130_v26 = vsel %vm1059_vm8, %v2047_v59, 0.0  ;;  %v697_v28 = vsel %vm626_vm11, %v2025_v50, 0.0  ;;  %v900_v31 = vsel %vm829_vm15, %v2035_v54, 0.0 }
  0xaf   : > { %vm1032_vm9 = vcmp.eq.s32.totalorder %v2293_v0, %v2001_v45  ;;  %vm520_vm10 = vcmp.eq.s32.totalorder %v2296_v1, %v1970_v34  ;;  %v1162_v32 = vadd.f32 %v1098_v25, %v959_v23  ;;  %v761_v35 = vadd.f32 %v697_v28, %v558_v14 }
  0xb0   : > { %v991_v27 = vadd.f32 %v927_v18, %v788_v17  ;;  %v1103_v30 = vsel %vm1032_vm9, %v2045_v58, 0.0  ;;  %v590_v41 = vsel %vm520_vm10, %v2009_v47, 0.0  ;;  %vm658_vm7 = vcmp.eq.s32.totalorder %v2296_v1, %v1985_v39 }
  0xb1   : > { %vm861_vm12 = vcmp.eq.s32.totalorder %v2296_v1, %v1993_v42  ;;  %vm1064_vm13 = vcmp.eq.s32.totalorder %v2296_v1, %v2001_v45  ;;  %1270 = vmatpush.msra.mxu2 %v1162_v32  ;;  %v964_v21 = vadd.f32 %v900_v31, %v761_v35  ;;  %v729_v52 = vsel %vm658_vm7, %v2025_v50, 0.0 }
  0xb2   : > { %v1194_v0 = vadd.f32 %v1130_v26, %v991_v27  ;;  %v932_v37 = vsel %vm861_vm12, %v2035_v54, 0.0  ;;  %v793_v53 = vadd.f32 %v729_v52, %v590_v41  ;;  %v1135_v56 = vsel %vm1064_vm13, %v2045_v58, 0.0 }
  0xb3   : > { %v2539_v29 = vadd.s32 40, %v1902_v9  ;;  %v2542_v57 = vadd.s32 168, %v1902_v9  ;;  %v1167_v60 = vadd.f32 %v1103_v30, %v964_v21  ;;  %vm486_vm14 = vcmp.eq.s32.totalorder %v2356_v44, %v1970_v34 }
  0xb4   : > { %1290 = vmatpush.msra.mxu3 %v1194_v0  ;;  %vm624_vm11 = vcmp.eq.s32.totalorder %v2356_v44, %v1985_v39  ;;  %vm827_vm15 = vcmp.eq.s32.totalorder %v2356_v44, %v1993_v42  ;;  %v996_v1 = vadd.f32 %v932_v37, %v793_v53  ;;  %v556_v10 = vsel %vm486_vm14, %v2009_v47, 0.0 }
  0xb5   : > { %vm481_vm0 = vcmp.eq.s32.totalorder %v2539_v29, %v1975_v36  ;;  %vm619_vm1 = vcmp.eq.s32.totalorder %v2539_v29, %v1987_v40  ;;  %vm822_vm2 = vcmp.eq.s32.totalorder %v2539_v29, %v1995_v43  ;;  %1227 = vmatpush.msra.mxu0 %v1167_v60  ;;  %vm1025_vm3 = vcmp.eq.s32.totalorder %v2539_v29, %v2003_v46 }
  0xb6   : > { %v551_v61 = vsel %vm481_vm0, %v2011_v48, 0.0  ;;  %v690_v62 = vsel %vm619_vm1, %v2027_v51, 0.0  ;;  %v893_v63 = vsel %vm822_vm2, %v2037_v55, 0.0  ;;  %v1199_v2 = vadd.f32 %v1135_v56, %v996_v1 }
  0xb7   : > { %v754_v33 = vadd.f32 %v690_v62, %v551_v61  ;;  %v1096_v13 = vsel %vm1025_vm3, %v2047_v59, 0.0  ;;  %vm513_vm4 = vcmp.eq.s32.totalorder %v2542_v57, %v1975_v36  ;;  %vm651_vm5 = vcmp.eq.s32.totalorder %v2542_v57, %v1987_v40 }
  0xb8   : > { %v583_v3 = vsel %vm513_vm4, %v2011_v48, 0.0  ;;  %vm854_vm6 = vcmp.eq.s32.totalorder %v2542_v57, %v1995_v43  ;;  %vm1057_vm8 = vcmp.eq.s32.totalorder %v2542_v57, %v2003_v46  ;;  %1247 = vmatpush.msra.mxu1 %v1199_v2  ;;  %v722_v5 = vsel %vm651_vm5, %v2027_v51, 0.0 }
  0xb9   : > { %v957_v4 = vadd.f32 %v893_v63, %v754_v33  ;;  %v925_v6 = vsel %vm854_vm6, %v2037_v55, 0.0  ;;  %v1128_v8 = vsel %vm1057_vm8, %v2047_v59, 0.0  ;;  %v786_v14 = vadd.f32 %v722_v5, %v583_v3 }
  0xba   : > { %v695_v11 = vsel %vm624_vm11, %v2025_v50, 0.0  ;;  %v898_v38 = vsel %vm827_vm15, %v2035_v54, 0.0  ;;  %vm1030_vm9 = vcmp.eq.s32.totalorder %v2356_v44, %v2001_v45  ;;  %vm518_vm10 = vcmp.eq.s32.totalorder %v2359_v49, %v1970_v34 }
  0xbb   : > { %v1160_v12 = vadd.f32 %v1096_v13, %v957_v4  ;;  %v759_v15 = vadd.f32 %v695_v11, %v556_v10  ;;  %v989_v25 = vadd.f32 %v925_v6, %v786_v14  ;;  %v1101_v16 = vsel %vm1030_vm9, %v2045_v58, 0.0 }
  0xbc   : > { %v588_v19 = vsel %vm518_vm10, %v2009_v47, 0.0  ;;  %vm656_vm7 = vcmp.eq.s32.totalorder %v2359_v49, %v1985_v39  ;;  %vm859_vm12 = vcmp.eq.s32.totalorder %v2359_v49, %v1993_v42  ;;  %vm1062_vm13 = vcmp.eq.s32.totalorder %v2359_v49, %v2001_v45 }
  0xbd   : > { %1271 = vmatpush.msra.mxu2 %v1160_v12  ;;  %v962_v23 = vadd.f32 %v898_v38, %v759_v15  ;;  %v727_v17 = vsel %vm656_vm7, %v2025_v50, 0.0  ;;  %v1192_v44 = vadd.f32 %v1128_v8, %v989_v25  ;;  %v930_v26 = vsel %vm859_vm12, %v2035_v54, 0.0 }
  0xbe   : > { %v791_v18 = vadd.f32 %v727_v17, %v588_v19  ;;  %v1133_v28 = vsel %vm1062_vm13, %v2045_v58, 0.0  ;;  %v2602_v32 = vadd.s32 32, %v1902_v9  ;;  %v2605_v27 = vadd.s32 160, %v1902_v9 }
  0xbf   : > { %v1165_v31 = vadd.f32 %v1101_v16, %v962_v23  ;;  %vm484_vm14 = vcmp.eq.s32.totalorder %v2416_v20, %v1970_v34  ;;  %1291 = vmatpush.msra.mxu3 %v1192_v44  ;;  %vm622_vm11 = vcmp.eq.s32.totalorder %v2416_v20, %v1985_v39  ;;  %vm825_vm15 = vcmp.eq.s32.totalorder %v2416_v20, %v1993_v42 }
  0xc0   : > { %v994_v35 = vadd.f32 %v930_v26, %v791_v18  ;;  %v554_v49 = vsel %vm484_vm14, %v2009_v47, 0.0  ;;  %vm479_vm0 = vcmp.eq.s32.totalorder %v2602_v32, %v1975_v36  ;;  %vm617_vm1 = vcmp.eq.s32.totalorder %v2602_v32, %v1987_v40 }
  0xc1   : > { %1228 = vmatpush.msra.mxu0 %v1165_v31  ;;  %vm820_vm2 = vcmp.eq.s32.totalorder %v2602_v32, %v1995_v43  ;;  %vm1023_vm3 = vcmp.eq.s32.totalorder %v2602_v32, %v2003_v46  ;;  %v549_v41 = vsel %vm479_vm0, %v2011_v48, 0.0  ;;  %v688_v0 = vsel %vm617_vm1, %v2027_v51, 0.0 }
  0xc2   : > { %v1197_v30 = vadd.f32 %v1133_v28, %v994_v35  ;;  %v891_v21 = vsel %vm820_vm2, %v2037_v55, 0.0  ;;  %v752_v52 = vadd.f32 %v688_v0, %v549_v41  ;;  %v1094_v37 = vsel %vm1023_vm3, %v2047_v59, 0.0 }
  0xc3   : > { %vm511_vm4 = vcmp.eq.s32.totalorder %v2605_v27, %v1975_v36  ;;  %vm649_vm5 = vcmp.eq.s32.totalorder %v2605_v27, %v1987_v40  ;;  %vm852_vm6 = vcmp.eq.s32.totalorder %v2605_v27, %v1995_v43  ;;  %vm1055_vm8 = vcmp.eq.s32.totalorder %v2605_v27, %v2003_v46 }
  0xc4   : > { %1248 = vmatpush.msra.mxu1 %v1197_v30  ;;  %v581_v53 = vsel %vm511_vm4, %v2011_v48, 0.0  ;;  %v720_v56 = vsel %vm649_vm5, %v2027_v51, 0.0  ;;  %v955_v60 = vadd.f32 %v891_v21, %v752_v52  ;;  %v923_v61 = vsel %vm852_vm6, %v2037_v55, 0.0  ;;  %v1214_v21 = vld [vmem:[%s1887_s28] sm:$0xff] }
  0xc5   : > { %v784_v1 = vadd.f32 %v720_v56, %v581_v53  ;;  %v1126_v62 = vsel %vm1055_vm8, %v2047_v59, 0.0  ;;  %v693_v63 = vsel %vm622_vm11, %v2025_v50, 0.0  ;;  %v896_v2 = vsel %vm825_vm15, %v2035_v54, 0.0  ;;  %1216 = vst [vmem:[#allocation1] ss:$2 sm:$0xff] %v1214_v21 }
  0xc6   : > { %vm1028_vm9 = vcmp.eq.s32.totalorder %v2416_v20, %v2001_v45  ;;  %vm516_vm10 = vcmp.eq.s32.totalorder %v2419_v22, %v1970_v34  ;;  %v1158_v33 = vadd.f32 %v1094_v37, %v955_v60  ;;  %v757_v3 = vadd.f32 %v693_v63, %v554_v49 }
  0xc7   : > { %v987_v13 = vadd.f32 %v923_v61, %v784_v1  ;;  %v1099_v4 = vsel %vm1028_vm9, %v2045_v58, 0.0  ;;  %v586_v5 = vsel %vm516_vm10, %v2009_v47, 0.0  ;;  %vm654_vm7 = vcmp.eq.s32.totalorder %v2419_v22, %v1985_v39 }
  0xc8   : > { %vm857_vm12 = vcmp.eq.s32.totalorder %v2419_v22, %v1993_v42  ;;  %vm1060_vm13 = vcmp.eq.s32.totalorder %v2419_v22, %v2001_v45  ;;  %1272 = vmatpush.msra.mxu2 %v1158_v33  ;;  %v960_v6 = vadd.f32 %v896_v2, %v757_v3  ;;  %v725_v8 = vsel %vm654_vm7, %v2025_v50, 0.0 }
  0xc9   : > { %v1190_v20 = vadd.f32 %v1126_v62, %v987_v13  ;;  %v928_v14 = vsel %vm857_vm12, %v2035_v54, 0.0  ;;  %v789_v10 = vadd.f32 %v725_v8, %v586_v5  ;;  %v1131_v11 = vsel %vm1060_vm13, %v2045_v58, 0.0 }
  0xca   : > { %v2662_v38 = vadd.s32 24, %v1902_v9  ;;  %v2665_v12 = vadd.s32 152, %v1902_v9  ;;  %v1163_v15 = vadd.f32 %v1099_v4, %v960_v6  ;;  %vm482_vm14 = vcmp.eq.s32.totalorder %v2479_v7, %v1970_v34 }
  0xcb   : > { %1292 = vmatpush.msra.mxu3 %v1190_v20  ;;  %vm620_vm11 = vcmp.eq.s32.totalorder %v2479_v7, %v1985_v39  ;;  %vm823_vm15 = vcmp.eq.s32.totalorder %v2479_v7, %v1993_v42  ;;  %v992_v22 = vadd.f32 %v928_v14, %v789_v10  ;;  %v552_v30 = vsel %vm482_vm14, %v2009_v47, 0.0 }
  0xcc   : > { %vm477_vm0 = vcmp.eq.s32.totalorder %v2662_v38, %v1975_v36  ;;  %vm615_vm1 = vcmp.eq.s32.totalorder %v2662_v38, %v1987_v40  ;;  %vm818_vm2 = vcmp.eq.s32.totalorder %v2662_v38, %v1995_v43  ;;  %1229 = vmatpush.msra.mxu0 %v1163_v15  ;;  %vm1021_vm3 = vcmp.eq.s32.totalorder %v2662_v38, %v2003_v46 }
  0xcd   : > { %v547_v25 = vsel %vm477_vm0, %v2011_v48, 0.0  ;;  %v686_v16 = vsel %vm615_vm1, %v2027_v51, 0.0  ;;  %v889_v19 = vsel %vm818_vm2, %v2037_v55, 0.0  ;;  %v1195_v23 = vadd.f32 %v1131_v11, %v992_v22 }
  0xce   : > { %v750_v17 = vadd.f32 %v686_v16, %v547_v25  ;;  %v1092_v44 = vsel %vm1021_vm3, %v2047_v59, 0.0  ;;  %vm509_vm4 = vcmp.eq.s32.totalorder %v2665_v12, %v1975_v36  ;;  %vm647_vm5 = vcmp.eq.s32.totalorder %v2665_v12, %v1987_v40 }
  0xcf   : > { %v579_v18 = vsel %vm509_vm4, %v2011_v48, 0.0  ;;  %vm850_vm6 = vcmp.eq.s32.totalorder %v2665_v12, %v1995_v43  ;;  %vm1053_vm8 = vcmp.eq.s32.totalorder %v2665_v12, %v2003_v46  ;;  %1249 = vmatpush.msra.mxu1 %v1195_v23  ;;  %v718_v28 = vsel %vm647_vm5, %v2027_v51, 0.0 }
  0xd0   : > { %v953_v26 = vadd.f32 %v889_v19, %v750_v17  ;;  %v921_v31 = vsel %vm850_vm6, %v2037_v55, 0.0  ;;  %v1124_v35 = vsel %vm1053_vm8, %v2047_v59, 0.0  ;;  %v782_v49 = vadd.f32 %v718_v28, %v579_v18 }
  0xd1   : > { %v691_v41 = vsel %vm620_vm11, %v2025_v50, 0.0  ;;  %v894_v0 = vsel %vm823_vm15, %v2035_v54, 0.0  ;;  %vm1026_vm9 = vcmp.eq.s32.totalorder %v2479_v7, %v2001_v45  ;;  %vm514_vm10 = vcmp.eq.s32.totalorder %v2482_v24, %v1970_v34 }
  0xd2   : > { %v1156_v52 = vadd.f32 %v1092_v44, %v953_v26  ;;  %v755_v37 = vadd.f32 %v691_v41, %v552_v30  ;;  %v985_v53 = vadd.f32 %v921_v31, %v782_v49  ;;  %v1097_v56 = vsel %vm1026_vm9, %v2045_v58, 0.0 }
  0xd3   : > { %v584_v60 = vsel %vm514_vm10, %v2009_v47, 0.0  ;;  %vm652_vm7 = vcmp.eq.s32.totalorder %v2482_v24, %v1985_v39  ;;  %vm855_vm12 = vcmp.eq.s32.totalorder %v2482_v24, %v1993_v42  ;;  %vm1058_vm13 = vcmp.eq.s32.totalorder %v2482_v24, %v2001_v45 }
  0xd4   : > { %1273 = vmatpush.msra.mxu2 %v1156_v52  ;;  %v958_v1 = vadd.f32 %v894_v0, %v755_v37  ;;  %v723_v61 = vsel %vm652_vm7, %v2025_v50, 0.0  ;;  %v1188_v7 = vadd.f32 %v1124_v35, %v985_v53  ;;  %v926_v63 = vsel %vm855_vm12, %v2035_v54, 0.0 }
  0xd5   : > { %v787_v62 = vadd.f32 %v723_v61, %v584_v60  ;;  %v1129_v2 = vsel %vm1058_vm13, %v2045_v58, 0.0  ;;  %v2726_v13 = vadd.s32 16, %v1902_v9  ;;  %v2729_v3 = vadd.s32 144, %v1902_v9 }
  0xd6   : > { %v1161_v33 = vadd.f32 %v1097_v56, %v958_v1  ;;  %vm480_vm14 = vcmp.eq.s32.totalorder %v2539_v29, %v1970_v34  ;;  %1293 = vmatpush.msra.mxu3 %v1188_v7  ;;  %vm618_vm11 = vcmp.eq.s32.totalorder %v2539_v29, %v1985_v39  ;;  %vm821_vm15 = vcmp.eq.s32.totalorder %v2539_v29, %v1993_v42 }
  0xd7   : > { %v990_v4 = vadd.f32 %v926_v63, %v787_v62  ;;  %v550_v24 = vsel %vm480_vm14, %v2009_v47, 0.0  ;;  %vm475_vm0 = vcmp.eq.s32.totalorder %v2726_v13, %v1975_v36  ;;  %vm613_vm1 = vcmp.eq.s32.totalorder %v2726_v13, %v1987_v40 }
  0xd8   : > { %1230 = vmatpush.msra.mxu0 %v1161_v33  ;;  %vm816_vm2 = vcmp.eq.s32.totalorder %v2726_v13, %v1995_v43  ;;  %vm1019_vm3 = vcmp.eq.s32.totalorder %v2726_v13, %v2003_v46  ;;  %v545_v20 = vsel %vm475_vm0, %v2011_v48, 0.0  ;;  %v684_v6 = vsel %vm613_vm1, %v2027_v51, 0.0 }
  0xd9   : > { %v1193_v5 = vadd.f32 %v1129_v2, %v990_v4  ;;  %v887_v8 = vsel %vm816_vm2, %v2037_v55, 0.0  ;;  %v748_v14 = vadd.f32 %v684_v6, %v545_v20  ;;  %v1090_v10 = vsel %vm1019_vm3, %v2047_v59, 0.0 }
  0xda   : > { %vm507_vm4 = vcmp.eq.s32.totalorder %v2729_v3, %v1975_v36  ;;  %vm645_vm5 = vcmp.eq.s32.totalorder %v2729_v3, %v1987_v40  ;;  %vm848_vm6 = vcmp.eq.s32.totalorder %v2729_v3, %v1995_v43  ;;  %vm1051_vm8 = vcmp.eq.s32.totalorder %v2729_v3, %v2003_v46 }
  0xdb   : > { %1250 = vmatpush.msra.mxu1 %v1193_v5  ;;  %v577_v11 = vsel %vm507_vm4, %v2011_v48, 0.0  ;;  %v716_v15 = vsel %vm645_vm5, %v2027_v51, 0.0  ;;  %v951_v22 = vadd.f32 %v887_v8, %v748_v14  ;;  %v919_v16 = vsel %vm848_vm6, %v2037_v55, 0.0 }
  0xdc   : > { %v780_v25 = vadd.f32 %v716_v15, %v577_v11  ;;  %v1122_v19 = vsel %vm1051_vm8, %v2047_v59, 0.0  ;;  %v689_v23 = vsel %vm618_vm11, %v2025_v50, 0.0  ;;  %v892_v17 = vsel %vm821_vm15, %v2035_v54, 0.0 }
  0xdd   : > { %vm1024_vm9 = vcmp.eq.s32.totalorder %v2539_v29, %v2001_v45  ;;  %vm512_vm10 = vcmp.eq.s32.totalorder %v2542_v57, %v1970_v34  ;;  %v1154_v44 = vadd.f32 %v1090_v10, %v951_v22  ;;  %v753_v26 = vadd.f32 %v689_v23, %v550_v24 }
  0xde   : > { %v983_v18 = vadd.f32 %v919_v16, %v780_v25  ;;  %v1095_v28 = vsel %vm1024_vm9, %v2045_v58, 0.0  ;;  %v582_v31 = vsel %vm512_vm10, %v2009_v47, 0.0  ;;  %vm650_vm7 = vcmp.eq.s32.totalorder %v2542_v57, %v1985_v39 }
  0xdf   : > { %vm853_vm12 = vcmp.eq.s32.totalorder %v2542_v57, %v1993_v42  ;;  %vm1056_vm13 = vcmp.eq.s32.totalorder %v2542_v57, %v2001_v45  ;;  %1274 = vmatpush.msra.mxu2 %v1154_v44  ;;  %v956_v35 = vadd.f32 %v892_v17, %v753_v26  ;;  %v721_v49 = vsel %vm650_vm7, %v2025_v50, 0.0 }
  0xe0   : > { %v1186_v29 = vadd.f32 %v1122_v19, %v983_v18  ;;  %v924_v30 = vsel %vm853_vm12, %v2035_v54, 0.0  ;;  %v785_v41 = vadd.f32 %v721_v49, %v582_v31  ;;  %v1127_v0 = vsel %vm1056_vm13, %v2045_v58, 0.0 }
  0xe1   : > { %v2786_v21 = vadd.s32 8, %v1902_v9  ;;  %v2789_v52 = vadd.s32 136, %v1902_v9  ;;  %v1159_v37 = vadd.f32 %v1095_v28, %v956_v35  ;;  %vm478_vm14 = vcmp.eq.s32.totalorder %v2602_v32, %v1970_v34 }
  0xe2   : > { %1294 = vmatpush.msra.mxu3 %v1186_v29  ;;  %vm616_vm11 = vcmp.eq.s32.totalorder %v2602_v32, %v1985_v39  ;;  %vm819_vm15 = vcmp.eq.s32.totalorder %v2602_v32, %v1993_v42  ;;  %v988_v57 = vadd.f32 %v924_v30, %v785_v41  ;;  %v548_v5 = vsel %vm478_vm14, %v2009_v47, 0.0 }
  0xe3   : > { %vm473_vm0 = vcmp.eq.s32.totalorder %v2786_v21, %v1975_v36  ;;  %vm611_vm1 = vcmp.eq.s32.totalorder %v2786_v21, %v1987_v40  ;;  %vm814_vm2 = vcmp.eq.s32.totalorder %v2786_v21, %v1995_v43  ;;  %1231 = vmatpush.msra.mxu0 %v1159_v37  ;;  %vm1017_vm3 = vcmp.eq.s32.totalorder %v2786_v21, %v2003_v46 }
  0xe4   : > { %v543_v53 = vsel %vm473_vm0, %v2011_v48, 0.0  ;;  %v682_v56 = vsel %vm611_vm1, %v2027_v51, 0.0  ;;  %v885_v60 = vsel %vm814_vm2, %v2037_v55, 0.0  ;;  %v1191_v1 = vadd.f32 %v1127_v0, %v988_v57 }
  0xe5   : > { %v746_v61 = vadd.f32 %v682_v56, %v543_v53  ;;  %v1088_v7 = vsel %vm1017_vm3, %v2047_v59, 0.0  ;;  %vm505_vm4 = vcmp.eq.s32.totalorder %v2789_v52, %v1975_v36  ;;  %vm643_vm5 = vcmp.eq.s32.totalorder %v2789_v52, %v1987_v40  ;;  %v2880_v56 = vld.sshfl [vmem:[#allocation1] sm:$0xff pattern:$0x75316420] }
  0xe6   : > { %v575_v62 = vsel %vm505_vm4, %v2011_v48, 0.0  ;;  %vm846_vm6 = vcmp.eq.s32.totalorder %v2789_v52, %v1995_v43  ;;  %vm1049_vm8 = vcmp.eq.s32.totalorder %v2789_v52, %v2003_v46  ;;  %1251 = vmatpush.msra.mxu1 %v1191_v1  ;;  %v714_v2 = vsel %vm643_vm5, %v2027_v51, 0.0 }
  0xe7   : > { %v949_v63 = vadd.f32 %v885_v60, %v746_v61  ;;  %v917_v33 = vsel %vm846_vm6, %v2037_v55, 0.0  ;;  %v1120_v4 = vsel %vm1049_vm8, %v2047_v59, 0.0  ;;  %v778_v24 = vadd.f32 %v714_v2, %v575_v62 }
  0xe8   : > { %v687_v20 = vsel %vm616_vm11, %v2025_v50, 0.0  ;;  %v890_v6 = vsel %vm819_vm15, %v2035_v54, 0.0  ;;  %vm1022_vm9 = vcmp.eq.s32.totalorder %v2602_v32, %v2001_v45  ;;  %vm510_vm10 = vcmp.eq.s32.totalorder %v2605_v27, %v1970_v34 }
  0xe9   : > { %v1152_v8 = vadd.f32 %v1088_v7, %v949_v63  ;;  %v751_v14 = vadd.f32 %v687_v20, %v548_v5  ;;  %v981_v10 = vadd.f32 %v917_v33, %v778_v24  ;;  %v1093_v11 = vsel %vm1022_vm9, %v2045_v58, 0.0 }
  0xea   : > { %v580_v15 = vsel %vm510_vm10, %v2009_v47, 0.0  ;;  %vm648_vm7 = vcmp.eq.s32.totalorder %v2605_v27, %v1985_v39  ;;  %vm851_vm12 = vcmp.eq.s32.totalorder %v2605_v27, %v1993_v42  ;;  %vm1054_vm13 = vcmp.eq.s32.totalorder %v2605_v27, %v2001_v45 }
  0xeb   : > { %1275 = vmatpush.msra.mxu2 %v1152_v8  ;;  %v954_v22 = vadd.f32 %v890_v6, %v751_v14  ;;  %v719_v25 = vsel %vm648_vm7, %v2025_v50, 0.0  ;;  %v1184_v32 = vadd.f32 %v1120_v4, %v981_v10  ;;  %v922_v19 = vsel %vm851_vm12, %v2035_v54, 0.0 }
  0xec   : > { %v783_v16 = vadd.f32 %v719_v25, %v580_v15  ;;  %v1125_v23 = vsel %vm1054_vm13, %v2045_v58, 0.0  ;;  %vm471_vm14 = vcmp.eq.s32.totalorder %v1902_v9, %v1975_v36  ;;  %vm609_vm11 = vcmp.eq.s32.totalorder %v1902_v9, %v1987_v40 }
  0xed   : > { %v1157_v17 = vadd.f32 %v1093_v11, %v954_v22  ;;  %vm812_vm15 = vcmp.eq.s32.totalorder %v1902_v9, %v1995_v43  ;;  %1295 = vmatpush.msra.mxu3 %v1184_v32  ;;  %v541_v27 = vsel %vm471_vm14, %v2011_v48, 0.0  ;;  %v680_v18 = vsel %vm609_vm11, %v2027_v51, 0.0 }
  0xee   : > { %v986_v44 = vadd.f32 %v922_v19, %v783_v16  ;;  %v883_v26 = vsel %vm812_vm15, %v2037_v55, 0.0  ;;  %v744_v28 = vadd.f32 %v680_v18, %v541_v27  ;;  %vm1015_vm0 = vcmp.eq.s32.totalorder %v1902_v9, %v2003_v46 }
  0xef   : > { %1232 = vmatpush.msra.mxu0 %v1157_v17  ;;  %v2860_v31 = vadd.s32 128, %v1902_v9  ;;  %vm476_vm1 = vcmp.eq.s32.totalorder %v2662_v38, %v1970_v34  ;;  %v1086_v35 = vsel %vm1015_vm0, %v2047_v59, 0.0  ;;  %vm614_vm2 = vcmp.eq.s32.totalorder %v2662_v38, %v1985_v39 }
  0xf0   : > { %v1189_v29 = vadd.f32 %v1125_v23, %v986_v44  ;;  %v546_v49 = vsel %vm476_vm1, %v2009_v47, 0.0  ;;  %v947_v30 = vadd.f32 %v883_v26, %v744_v28  ;;  %vm817_vm8 = vcmp.eq.s32.totalorder %v2662_v38, %v1993_v42 }
  0xf1   : > { %vm503_vm3 = vcmp.eq.s32.totalorder %v2860_v31, %v1975_v36  ;;  %vm641_vm4 = vcmp.eq.s32.totalorder %v2860_v31, %v1987_v40  ;;  %vm844_vm5 = vcmp.eq.s32.totalorder %v2860_v31, %v1995_v43  ;;  %vm1047_vm6 = vcmp.eq.s32.totalorder %v2860_v31, %v2003_v46 }
  0xf2   : > { %1252 = vmatpush.msra.mxu1 %v1189_v29  ;;  %v573_v41 = vsel %vm503_vm3, %v2011_v48, 0.0  ;;  %v712_v0 = vsel %vm641_vm4, %v2027_v51, 0.0  ;;  %v915_v37 = vsel %vm844_vm5, %v2037_v55, 0.0  ;;  %v1150_v57 = vadd.f32 %v1086_v35, %v947_v30 }
  0xf3   : > { %v776_v53 = vadd.f32 %v712_v0, %v573_v41  ;;  %v1118_v36 = vsel %vm1047_vm6, %v2047_v59, 0.0  ;;  %v685_v40 = vsel %vm614_vm2, %v2025_v50, 0.0  ;;  %vm1020_vm9 = vcmp.eq.s32.totalorder %v2662_v38, %v2001_v45  ;;  %v2899_v38 = vld.sshfl [vmem:[#allocation1 + $0x8] sm:$0xff pattern:$0x75316420] }
  0xf4   : > { %v749_v60 = vadd.f32 %v685_v40, %v546_v49  ;;  %vm508_vm10 = vcmp.eq.s32.totalorder %v2665_v12, %v1970_v34  ;;  %1276 = vmatpush.msra.mxu2 %v1150_v57  ;;  %v888_v46 = vsel %vm817_vm8, %v2035_v54, 0.0  ;;  %v1091_v48 = vsel %vm1020_vm9, %v2045_v58, 0.0 }
  0xf5   : > { %v979_v43 = vadd.f32 %v915_v37, %v776_v53  ;;  %v578_v51 = vsel %vm508_vm10, %v2009_v47, 0.0  ;;  %1277 = vmatmul.f32.vlgmr.msra.gmra.mxu2 %v2880_v56  ;;  %vm646_vm7 = vcmp.eq.s32.totalorder %v2665_v12, %v1985_v39  ;;  %vm849_vm12 = vcmp.eq.s32.totalorder %v2665_v12, %v1993_v42 }
  0xf6   : > { %v952_v55 = vadd.f32 %v888_v46, %v749_v60  ;;  %vm1052_vm13 = vcmp.eq.s32.totalorder %v2665_v12, %v2001_v45  ;;  %v717_v1 = vsel %vm646_vm7, %v2025_v50, 0.0  ;;  %v920_v61 = vsel %vm849_vm12, %v2035_v54, 0.0 }
  0xf7   : > { %v1182_v59 = vadd.f32 %v1118_v36, %v979_v43  ;;  %v1123_v7 = vsel %vm1052_vm13, %v2045_v58, 0.0  ;;  %v781_v63 = vadd.f32 %v717_v1, %v578_v51  ;;  %vm474_vm14 = vcmp.eq.s32.totalorder %v2726_v13, %v1970_v34 }
  0xf8   : > { %v1155_v62 = vadd.f32 %v1091_v48, %v952_v55  ;;  %vm612_vm11 = vcmp.eq.s32.totalorder %v2726_v13, %v1985_v39  ;;  %v544_v12 = vsel %vm474_vm14, %v2009_v47, 0.0  ;;  %vm815_vm15 = vcmp.eq.s32.totalorder %v2726_v13, %v1993_v42 }
  0xf9   : > { %1296 = vmatpush.msra.mxu3 %v1182_v59  ;;  %v683_v2 = vsel %vm612_vm11, %v2025_v50, 0.0  ;;  %vm1018_vm0 = vcmp.eq.s32.totalorder %v2726_v13, %v2001_v45  ;;  %v984_v33 = vadd.f32 %v920_v61, %v781_v63  ;;  %v886_v24 = vsel %vm815_vm15, %v2035_v54, 0.0 }
  0xfa   : > { %1297 = vmatmul.f32.vlgmr.msra.gmra.mxu3 %v2899_v38  ;;  %1233 = vmatpush.msra.mxu0 %v1155_v62  ;;  %v747_v4 = vadd.f32 %v683_v2, %v544_v12  ;;  %v1089_v5 = vsel %vm1018_vm0, %v2045_v58, 0.0  ;;  %vm506_vm1 = vcmp.eq.s32.totalorder %v2729_v3, %v1970_v34  ;;  %vm644_vm2 = vcmp.eq.s32.totalorder %v2729_v3, %v1985_v39 }
  0xfb   : > { %vm847_vm3 = vcmp.eq.s32.totalorder %v2729_v3, %v1993_v42  ;;  %vm1050_vm4 = vcmp.eq.s32.totalorder %v2729_v3, %v2001_v45  ;;  %v1187_v13 = vadd.f32 %v1123_v7, %v984_v33  ;;  %v576_v6 = vsel %vm506_vm1, %v2009_v47, 0.0 }
  0xfc   : > { %v950_v20 = vadd.f32 %v886_v24, %v747_v4  ;;  %v715_v8 = vsel %vm644_vm2, %v2025_v50, 0.0  ;;  %v918_v10 = vsel %vm847_vm3, %v2035_v54, 0.0  ;;  %v1121_v11 = vsel %vm1050_vm4, %v2045_v58, 0.0 }
  0xfd   : > { %v779_v14 = vadd.f32 %v715_v8, %v576_v6  ;;  %vm472_vm5 = vcmp.eq.s32.totalorder %v2786_v21, %v1970_v34  ;;  %1253 = vmatpush.msra.mxu1 %v1187_v13  ;;  %vm610_vm6 = vcmp.eq.s32.totalorder %v2786_v21, %v1985_v39  ;;  %vm813_vm8 = vcmp.eq.s32.totalorder %v2786_v21, %v1993_v42 }
  0xfe   : > { %v1153_v15 = vadd.f32 %v1089_v5, %v950_v20  ;;  %v542_v22 = vsel %vm472_vm5, %v2009_v47, 0.0  ;;  %v681_v25 = vsel %vm610_vm6, %v2025_v50, 0.0  ;;  %v884_v32 = vsel %vm813_vm8, %v2035_v54, 0.0 }
  0xff   : > { %v982_v3 = vadd.f32 %v918_v10, %v779_v14  ;;  %vm1016_vm9 = vcmp.eq.s32.totalorder %v2786_v21, %v2001_v45  ;;  %v745_v16 = vadd.f32 %v681_v25, %v542_v22  ;;  %vm504_vm10 = vcmp.eq.s32.totalorder %v2789_v52, %v1970_v34 }
 0x100   : > { %1234 = vmatpush.msra.mxu0 %v1153_v15  ;;  %v1087_v19 = vsel %vm1016_vm9, %v2045_v58, 0.0  ;;  %vm642_vm7 = vcmp.eq.s32.totalorder %v2789_v52, %v1985_v39  ;;  %v574_v17 = vsel %vm504_vm10, %v2009_v47, 0.0  ;;  %vm845_vm12 = vcmp.eq.s32.totalorder %v2789_v52, %v1993_v42 }
 0x101   : > { %v1185_v23 = vadd.f32 %v1121_v11, %v982_v3  ;;  %v713_v44 = vsel %vm642_vm7, %v2025_v50, 0.0  ;;  %v948_v27 = vadd.f32 %v884_v32, %v745_v16  ;;  %v916_v18 = vsel %vm845_vm12, %v2035_v54, 0.0 }
 0x102   : > { %v777_v21 = vadd.f32 %v713_v44, %v574_v17  ;;  %vm1048_vm13 = vcmp.eq.s32.totalorder %v2789_v52, %v2001_v45  ;;  %vm470_vm14 = vcmp.eq.s32.totalorder %v1902_v9, %v1970_v34  ;;  %vm608_vm11 = vcmp.eq.s32.totalorder %v1902_v9, %v1985_v39 }
 0x103   : > { %1254 = vmatpush.msra.mxu1 %v1185_v23  ;;  %v1119_v26 = vsel %vm1048_vm13, %v2045_v58, 0.0  ;;  %vm811_vm15 = vcmp.eq.s32.totalorder %v1902_v9, %v1993_v42  ;;  %v1151_v28 = vadd.f32 %v1087_v19, %v948_v27  ;;  %v540_v35 = vsel %vm470_vm14, %v2009_v47, 0.0 }
 0x104   : > { %v980_v29 = vadd.f32 %v916_v18, %v777_v21  ;;  %v679_v49 = vsel %vm608_vm11, %v2025_v50, 0.0  ;;  %v882_v52 = vsel %vm811_vm15, %v2035_v54, 0.0  ;;  %vm1014_vm0 = vcmp.eq.s32.totalorder %v1902_v9, %v2001_v45 }
 0x105   : > { %v743_v30 = vadd.f32 %v679_v49, %v540_v35  ;;  %vm502_vm1 = vcmp.eq.s32.totalorder %v2860_v31, %v1970_v34  ;;  %1235 = vmatpush.msra.mxu0 %v1151_v28  ;;  %v1085_v0 = vsel %vm1014_vm0, %v2045_v58, 0.0  ;;  %vm640_vm2 = vcmp.eq.s32.totalorder %v2860_v31, %v1985_v39 }
 0x106   : > { %v1183_v41 = vadd.f32 %v1119_v26, %v980_v29  ;;  %v572_v37 = vsel %vm502_vm1, %v2009_v47, 0.0  ;;  %v711_v53 = vsel %vm640_vm2, %v2025_v50, 0.0  ;;  %vm843_vm3 = vcmp.eq.s32.totalorder %v2860_v31, %v1993_v42 }
 0x107   : > { %v946_v57 = vadd.f32 %v882_v52, %v743_v30  ;;  %vm1046_vm4 = vcmp.eq.s32.totalorder %v2860_v31, %v2001_v45  ;;  %v775_v9 = vadd.f32 %v711_v53, %v572_v37  ;;  %v914_v34 = vsel %vm843_vm3, %v2035_v54, 0.0 }
 0x108   : > { %1255 = vmatpush.msra.mxu1 %v1183_v41  ;;  %v1117_v47 = vsel %vm1046_vm4, %v2045_v58, 0.0  ;;  %vm1304_vm5 = vcmask 1043456  }
 0x109   : > { %v1149_v36 = vadd.f32 %v1085_v0, %v946_v57  ;;  %v978_v40 = vadd.f32 %v914_v34, %v775_v9 }
 0x10b   : > { %1236 = vmatpush.msra.mxu0 %v1149_v36  ;;  %v1181_v39 = vadd.f32 %v1117_v47, %v978_v40 }
 0x10c   : > { %1237 = vmatmul.f32.vlgmr.msra.gmra.mxu0 %v2880_v56 }
 0x10d   : > { %1256 = vmatpush.msra.mxu1 %v1181_v39 }
 0x10e   : > { %1257 = vmatmul.f32.vlgmr.msra.gmra.mxu1 %v2899_v38 }
 0x178   : > { %v1278_v42 = vpop.f32.mrf.mxu2 }
 0x17d   : > { %v1298_v50 = vpop.f32.mrf.mxu3 }
 0x17e   : > { %v1299_v45 = vadd.f32 %v1298_v50, %v1278_v42 }
 0x180   : > { %v1303_v31 = vrot.slane %v1299_v45, 4 }
 0x189   : > { %v1238_v54 = vpop.f32.mrf.mxu0 }
 0x18b   : > { %v1258_v58 = vpop.f32.mrf.mxu1 }
 0x18c   : > { %v1259_v56 = vadd.f32 %v1258_v58, %v1238_v54 }
 0x18e   : > { %v1305_v60 = vsel %vm1304_vm5, %v1259_v56, %v1303_v31 }
 0x18f   : > { %1313 = vst [vmem:[%s277_s27] sm:$0xff] %v1305_v60 }
 0x190   : > { %1677 = shalt.err (!%p1674_p13)
}
 0x191   : > { %1490 = dma.vmem_to_hbm [thread:$0]  (%p1851_p0), %s1331_s30, 128, %s1333_s4, %s1315_s15  }
 0x192 PF: > { %s1344_s22 = sand.u32 1, %s1720_s12   ;;  %p1504_p4 = pnand %p1459_p3, %p1855_p2 }
 0x193   : > { %s1345_s6 = scalar_lea.sflag [#allocation7], %s1344_s22 }
 0x194   : > { %p1505_p5 = pneg %p1504_p4 }
 0x196   : > { %1715 = dma.done.wait (%p1505_p5), %s1345_s6, 128  }
 0x197   : > { %1717 = vsyncadd (%p1505_p5), %s1345_s6, 4294967168  ;;  %s20_s17 = sadd.s32 1, %s1740_s17   ;;  %s3031_s12 = smov %s1724_s13 }
 0x198   : > { %p17_p1 = scmp.ge.s32.totalorder %s20_s17, 4   ;;  %s3032_s13 = smov %s1728_s14 }
 0x199   : > { %s3033_s14 = smov %s1815_s25  ;;  %s3034_s15 = smov %s1736_s16 }
 0x19a   : > { %s3035_s16 = smov %s3037_s18  ;;  %19 = sbr.rel (!%p17_p1) target bundleno = 7 (0x7), region = 113 }
 0x19f   :  { %1351 = vsyncpa [#allocation6], 1 }
 0x1a0   :  { %1353 = vsyncpa [#allocation6 + $0x1], 1 }
 0x1a1   :  { %1354 = vsyncpa [#allocation9], 1 }
 0x1a2   :  { %1355 = vsyncpa [#allocation7], 1 }
 0x1a3   :  { %1357 = vsyncpa [#allocation7 + $0x1], 1 }

</bundles_post_ra>
